<compile_context>
chip_gen: v7x
topology: tpu7x:2x2x1
jax: 0.10.0
libtpu: 0.0.40
codegen_flags: <defaults>
</compile_context>

<pallas_src>
import math
import functools

import jax
import jax.numpy as jnp
from jax.experimental import pallas as pl
from jax.experimental.pallas import tpu as pltpu


def _round_up(v, m):
    return (v + m - 1) // m * m


def _choose_samples_per_step(n, hw, target_lanes=2048):
    """Pack samples along the lane axis to amortize per-step overhead, but keep
    >= 2 grid steps when N >= 2 so both v7x TensorCores get work."""
    s = max(1, min(n, target_lanes // max(hw, 1)))
    if n >= 2:
        s = min(s, max(1, n // 2))
    return max(1, s)


# ----------------------------------------------------------------------------
# Fused kernel: one grid step == S batch samples, everything stays on-chip.
# ----------------------------------------------------------------------------

def _adain_resblk_kernel(mask_ref, x_ref, s_ref, fc_w_ref, fc_b_ref,
                         c1_w_ref, c1_b_ref, c2_w_ref, c2_b_ref,
                         o_ref, patches_ref, *,
                         H, W, S, Cin_p, Cout_p, eps, slope, res_scale,
                         learned_sc):
    HW = H * W
    L = S * HW

    # ---- pack the S samples of this step along the lane axis ----------------
    if S == 1:
        x = x_ref[0]                                              # (Cin_p, HW)
    else:
        x = jnp.concatenate([x_ref[j] for j in range(S)], axis=1)  # (Cin_p, L)

    # ---- AdaIN style affines: both FCs fused into one weight, evaluated on
    # the VPU (broadcast-mul + lane reduce) per packed sample.  Row layout of
    # h_j: [gamma1 (Cin_p) | beta1 (Cin_p) | gamma2 (Cout_p) | beta2 (Cout_p)].
    fc_w = fc_w_ref[...]
    fc_b = fc_b_ref[...]
    hs = [jnp.sum(fc_w * s_ref[j], axis=1, keepdims=True) + fc_b
          for j in range(S)]                                      # S x (R, 1)

    def adain_lrelu(t, g_off, b_off, C):
        # Per-sample InstanceNorm2d(affine=False) over each HW lane segment
        # (biased variance), then (1+gamma)*x_hat + beta and LeakyReLU(slope).
        outs = []
        for j in range(S):
            tj = t[:, j * HW:(j + 1) * HW] if S > 1 else t
            g = hs[j][g_off:g_off + C, :]
            b = hs[j][b_off:b_off + C, :]
            mean = jnp.mean(tj, axis=1, keepdims=True)
            var = jnp.mean((tj - mean) ** 2, axis=1, keepdims=True)
            yj = (1.0 + g) * ((tj - mean) * jax.lax.rsqrt(var + eps)) + b
            outs.append(jnp.where(yj >= 0, yj, slope * yj))
        return outs[0] if S == 1 else jnp.concatenate(outs, axis=1)

    # per-tap flat-index shifts for the 3x3 "same" conv
    shifts = [(dy - 1) * W + (dx - 1) for dy in range(3) for dx in range(3)]

    def conv3x3(t, C, w_ref, b_ref, extra_rows=0):
        # Build the (9*C [+ extra], L) im2col matrix in sublane-aligned VMEM
        # scratch, then ONE MXU matmul.  Rolls that bleed across image edges
        # (including across concatenated samples) are zeroed by the hoisted
        # boundary masks.
        for tap, sft in enumerate(shifts):
            r0 = tap * C
            if sft == 0:
                patches_ref[r0:r0 + C, :] = t                     # center tap
            else:
                rolled = pltpu.roll(t, shift=(-sft) % L, axis=1)
                patches_ref[r0:r0 + C, :] = rolled * mask_ref[tap]
        rows = 9 * C + extra_rows
        return jnp.dot(w_ref[...], patches_ref[0:rows, :],
                       preferred_element_type=jnp.float32) + b_ref[...]

    # ---- residual branch -----------------------------------------------------
    y = adain_lrelu(x, 0, Cin_p, Cin_p)
    y = conv3x3(y, Cin_p, c1_w_ref, c1_b_ref)                     # (Cout_p, L)
    y = adain_lrelu(y, 2 * Cin_p, 2 * Cin_p + Cout_p, Cout_p)

    if learned_sc:
        # 1x1 shortcut fused into the conv2 matmul: weight = [conv2 | conv1x1],
        # operand = [patches(y) ; x]  ->  one dot = conv2(y) + bias + shortcut.
        patches_ref[9 * Cout_p:9 * Cout_p + Cin_p, :] = x
        o = conv3x3(y, Cout_p, c2_w_ref, c2_b_ref,
                    extra_rows=Cin_p) * res_scale
    else:
        # identity shortcut (dim_in == dim_out): free residual add, no matmul.
        o = (conv3x3(y, Cout_p, c2_w_ref, c2_b_ref) + x) * res_scale

    # ---- per-sample lane-dense stores: unmasked (Cout_p, HW) slabs -----------
    if S == 1:
        o_ref[0] = o
    else:
        for j in range(S):
            o_ref[j] = o[:, j * HW:(j + 1) * HW]


# ----------------------------------------------------------------------------
# Wrapper
# ----------------------------------------------------------------------------

def adain_resblk_forward(x_nchw, s, params, *, eps=1e-5, slope=0.2,
                         samples_per_step=None):
    """AdainResBlk.forward with w_hpf=0, upsample=False. NCHW in / NCHW out."""
    # TODO(synk): nearest 2x upsample path (upsample=True) not implemented.
    N, Cin, H, W = x_nchw.shape
    Cout = params["conv1_w"].shape[0]
    HW = H * W
    style_dim = s.shape[1]
    learned_sc = "conv1x1_w" in params
    f32 = jnp.float32

    Cin_p = _round_up(Cin, 8)         # 8-sublane alignment for the tap slabs
    Cout_p = _round_up(Cout, 8)

    if samples_per_step is None:
        samples_per_step = _choose_samples_per_step(N, HW)
    S = int(samples_per_step)
    G = -(-N // S)                    # grid steps
    N_pad = G * S
    L = S * HW

    # ---- activations: pad batch/channels, flatten spatial (free reshapes) ---
    xf = jnp.pad(x_nchw.astype(f32),
                 ((0, N_pad - N), (0, Cin_p - Cin), (0, 0), (0, 0)))
    x_flat = xf.reshape(N_pad, Cin_p, HW)
    s3 = jnp.pad(s.astype(f32), ((0, N_pad - N), (0, 0))
                 ).reshape(N_pad, 1, style_dim)

    # ---- static "same"-padding boundary masks, hoisted out of the kernel ----
    pos = jnp.arange(HW, dtype=jnp.int32)
    hh, ww = pos // W, pos % W
    mrows = []
    for dy in range(3):
        for dx in range(3):
            oy, ox = dy - 1, dx - 1
            mrows.append((hh + oy >= 0) & (hh + oy < H) &
                         (ww + ox >= 0) & (ww + ox < W))
    mask = jnp.stack(mrows, 0).astype(f32)                    # (9, HW)
    mask = jnp.tile(mask, (1, S)).reshape(9, 1, L)            # (9, 1, S*HW)

    # ---- weights: layout plumbing done once (constant-folded under jit) ------
    def conv_w_2d(w, cp_out, cp_in):
        co, ci = w.shape[0], w.shape[1]
        w = jnp.transpose(w.astype(f32), (0, 2, 3, 1))        # (co, 3, 3, ci)
        w = jnp.pad(w, ((0, cp_out - co), (0, 0), (0, 0), (0, cp_in - ci)))
        return w.reshape(cp_out, 9 * cp_in)                   # k = tap*cp_in + ci

    def pad_rows(a, r):
        return jnp.pad(a, ((0, r - a.shape[0]), (0, 0)))

    c1_w = conv_w_2d(params["conv1_w"], Cout_p, Cin_p)
    c1_b = pad_rows(params["conv1_b"].astype(f32).reshape(Cout, 1), Cout_p)
    c2_w = conv_w_2d(params["conv2_w"], Cout_p, Cout_p)
    c2_b = pad_rows(params["conv2_b"].astype(f32).reshape(Cout, 1), Cout_p)
    if learned_sc:
        sc_w = pad_rows(
            jnp.pad(params["conv1x1_w"].astype(f32).reshape(Cout, Cin),
                    ((0, 0), (0, Cin_p - Cin))), Cout_p)
        c2_w = jnp.concatenate([c2_w, sc_w], axis=1)  # fuse shortcut into conv2

    def fc_padded(w, b, c, cp):
        w = w.astype(f32)
        b = b.astype(f32).reshape(-1, 1)
        zw = jnp.zeros((cp - c, w.shape[1]), f32)
        zb = jnp.zeros((cp - c, 1), f32)
        return (jnp.concatenate([w[:c], zw, w[c:], zw], 0),
                jnp.concatenate([b[:c], zb, b[c:], zb], 0))

    fc1_w, fc1_b = fc_padded(params["fc1_w"], params["fc1_b"], Cin, Cin_p)
    fc2_w, fc2_b = fc_padded(params["fc2_w"], params["fc2_b"], Cout, Cout_p)
    fc_w = jnp.concatenate([fc1_w, fc2_w], 0)     # both AdaIN FCs in one pass
    fc_b = jnp.concatenate([fc1_b, fc2_b], 0)

    # im2col scratch rows: conv1 needs 9*Cin_p; conv2 (+fused shortcut) needs
    # 9*Cout_p (+ Cin_p)
    P = max(9 * Cin_p, 9 * Cout_p + (Cin_p if learned_sc else 0))

    kern = functools.partial(
        _adain_resblk_kernel, H=H, W=W, S=S, Cin_p=Cin_p, Cout_p=Cout_p,
        eps=eps, slope=slope, res_scale=1.0 / math.sqrt(2.0),
        learned_sc=learned_sc)

    def const2(a):  # small 2-D parameter, same block every step
        return pl.BlockSpec(a.shape, lambda g: (0, 0))

    out = pl.pallas_call(
        kern,
        out_shape=jax.ShapeDtypeStruct((N_pad, Cout_p, HW), f32),
        grid=(G,),
        in_specs=[
            pl.BlockSpec((9, 1, L), lambda g: (0, 0, 0)),           # masks (const)
            pl.BlockSpec((S, Cin_p, HW), lambda g: (g, 0, 0)),      # S samples
            pl.BlockSpec((S, 1, style_dim), lambda g: (g, 0, 0)),   # their styles
            const2(fc_w), const2(fc_b),
            const2(c1_w), const2(c1_b), const2(c2_w), const2(c2_b),
        ],
        out_specs=pl.BlockSpec((S, Cout_p, HW), lambda g: (g, 0, 0)),
        scratch_shapes=[pltpu.VMEM((P, L), f32)],                   # im2col matrix
        compiler_params=pltpu.CompilerParams(
            dimension_semantics=("parallel",)),                     # v7x: 2 TCs
    )(mask, x_flat, s3, fc_w, fc_b, c1_w, c1_b, c2_w, c2_b)

    out = out.reshape(N_pad, Cout_p, H, W)
    return out[:N, :Cout]


# ----------------------------------------------------------------------------
# Parameters (PyTorch-native layouts) and a pure-JAX reference for validation
# ----------------------------------------------------------------------------

def init_params(key, dim_in, dim_out, style_dim):
    ks = jax.random.split(key, 9)
    sc = 0.1
    p = {
        "conv1_w": sc * jax.random.normal(ks[0], (dim_out, dim_in, 3, 3), jnp.float32),
        "conv1_b": sc * jax.random.normal(ks[1], (dim_out,), jnp.float32),
        "conv2_w": sc * jax.random.normal(ks[2], (dim_out, dim_out, 3, 3), jnp.float32),
        "conv2_b": sc * jax.random.normal(ks[3], (dim_out,), jnp.float32),
        "fc1_w": sc * jax.random.normal(ks[4], (2 * dim_in, style_dim), jnp.float32),
        "fc1_b": sc * jax.random.normal(ks[5], (2 * dim_in,), jnp.float32),
        "fc2_w": sc * jax.random.normal(ks[6], (2 * dim_out, style_dim), jnp.float32),
        "fc2_b": sc * jax.random.normal(ks[7], (2 * dim_out,), jnp.float32),
    }
    if dim_in != dim_out:
        p["conv1x1_w"] = sc * jax.random.normal(
            ks[8], (dim_out, dim_in, 1, 1), jnp.float32)
    return p


def adain_resblk_reference(x_nchw, s, params, *, eps=1e-5, slope=0.2):
    """Pure-JAX/XLA reference mirroring the PyTorch module."""
    x = x_nchw.astype(jnp.float32)
    s = s.astype(jnp.float32)

    def adain(t, fc_w, fc_b):
        C = t.shape[1]
        h = s @ fc_w.T + fc_b
        gamma = h[:, :C][:, :, None, None]
        beta = h[:, C:][:, :, None, None]
        mean = jnp.mean(t, axis=(2, 3), keepdims=True)
        var = jnp.mean((t - mean) ** 2, axis=(2, 3), keepdims=True)
        return (1.0 + gamma) * ((t - mean) * jax.lax.rsqrt(var + eps)) + beta

    def lrelu(t):
        return jnp.where(t >= 0, t, slope * t)

    def conv(t, w, b=None, pad=1):
        out = jax.lax.conv_general_dilated(
            t, w, window_strides=(1, 1), padding=((pad, pad), (pad, pad)),
            dimension_numbers=("NCHW", "OIHW", "NCHW"))
        return out if b is None else out + b[None, :, None, None]

    y = lrelu(adain(x, params["fc1_w"], params["fc1_b"]))
    y = conv(y, params["conv1_w"], params["conv1_b"])
    y = lrelu(adain(y, params["fc2_w"], params["fc2_b"]))
    y = conv(y, params["conv2_w"], params["conv2_b"])
    sc = conv(x, params["conv1x1_w"], None, pad=0) if "conv1x1_w" in params else x
    return (y + sc) / math.sqrt(2.0)


# ----------------------------------------------------------------------------
# Main
# ----------------------------------------------------------------------------

if __name__ == "__main__":
    key = jax.random.PRNGKey(0)

    # Config A: learned 1x1 shortcut (dim_in != dim_out); exercises lane-axis
    # batch packing (S=2 samples per step, grid=2 so both v7x TCs get work).
    N, dim_in, dim_out, H, W, style_dim = 4, 4, 8, 16, 16, 16
    k1, k2, k3, key = jax.random.split(key, 4)
    x = jax.random.normal(k1, (N, dim_in, H, W), jnp.float32)     # NCHW
    s = jax.random.normal(k2, (N, style_dim), jnp.float32)
    params = init_params(k3, dim_in, dim_out, style_dim)

    out = jax.block_until_ready(adain_resblk_forward(x, s, params))
    assert out.shape == (N, dim_out, H, W), out.shape
    assert bool(jnp.all(jnp.isfinite(out)))
    ref = jax.block_until_ready(adain_resblk_reference(x, s, params))
    err_a = float(jnp.max(jnp.abs(out - ref)))
    # Loose tolerance: MXU f32 matmuls may use reduced-precision passes.
    assert bool(jnp.allclose(out, ref, rtol=5e-2, atol=5e-2)), err_a

    # Config B: identity shortcut (dim_in == dim_out), S=1 path.
    N2, d2 = 2, 8
    k1, k2, k3, key = jax.random.split(key, 4)
    x2 = jax.random.normal(k1, (N2, d2, H, W), jnp.float32)
    s2 = jax.random.normal(k2, (N2, style_dim), jnp.float32)
    params2 = init_params(k3, d2, d2, style_dim)

    out2 = jax.block_until_ready(adain_resblk_forward(x2, s2, params2))
    assert out2.shape == (N2, d2, H, W), out2.shape
    ref2 = jax.block_until_ready(adain_resblk_reference(x2, s2, params2))
    err_b = float(jnp.max(jnp.abs(out2 - ref2)))
    assert bool(jnp.allclose(out2, ref2, rtol=5e-2, atol=5e-2)), err_b

    print("KERNEL_OK")
</pallas_src>

<mosaic_0001>
module attributes {stable_mosaic.version = 11 : i64} {
  func.func @_adain_resblk_kernel(%arg0: i32, %arg1: memref<9x1x512xf32, #tpu.memory_space<vmem>>, %arg2: memref<2x8x256xf32, #tpu.memory_space<vmem>>, %arg3: memref<2x1x16xf32, #tpu.memory_space<vmem>>, %arg4: memref<32x16xf32, #tpu.memory_space<vmem>>, %arg5: memref<32x1xf32, #tpu.memory_space<vmem>>, %arg6: memref<8x72xf32, #tpu.memory_space<vmem>>, %arg7: memref<8x1xf32, #tpu.memory_space<vmem>>, %arg8: memref<8x80xf32, #tpu.memory_space<vmem>>, %arg9: memref<8x1xf32, #tpu.memory_space<vmem>>, %arg10: memref<2x8x256xf32, #tpu.memory_space<vmem>>, %arg11: memref<80x512xf32, #tpu.memory_space<vmem>>) attributes {dimension_semantics = [#tpu.dimension_semantics<parallel>], iteration_bounds = array<i64: 2>, scalar_prefetch = 0 : i64, scratch_operands = 1 : i64, tpu.core_type = #tpu.core_type<tc>, window_params = [{pipeline_mode = #tpu.pipeline_mode<synchronous>, transform_indices = @transform_0, window_bounds = array<i64: 9, 1, 512>}, {transform_indices = @transform_1, window_bounds = array<i64: 2, 8, 256>}, {transform_indices = @transform_2, window_bounds = array<i64: 2, 1, 16>}, {pipeline_mode = #tpu.pipeline_mode<synchronous>, transform_indices = @transform_3, window_bounds = array<i64: 32, 16>}, {pipeline_mode = #tpu.pipeline_mode<synchronous>, transform_indices = @transform_4, window_bounds = array<i64: 32, 1>}, {pipeline_mode = #tpu.pipeline_mode<synchronous>, transform_indices = @transform_5, window_bounds = array<i64: 8, 72>}, {pipeline_mode = #tpu.pipeline_mode<synchronous>, transform_indices = @transform_6, window_bounds = array<i64: 8, 1>}, {pipeline_mode = #tpu.pipeline_mode<synchronous>, transform_indices = @transform_7, window_bounds = array<i64: 8, 80>}, {pipeline_mode = #tpu.pipeline_mode<synchronous>, transform_indices = @transform_8, window_bounds = array<i64: 8, 1>}, {transform_indices = @transform_9, window_bounds = array<i64: 2, 8, 256>}]} {
    %c0 = arith.constant 0 : index
    %c0_0 = arith.constant 0 : index
    %c0_1 = arith.constant 0 : index
    %0 = vector.load %arg2[%c0, %c0_0, %c0_1] : memref<2x8x256xf32, #tpu.memory_space<vmem>>, vector<1x8x256xf32>
    %1 = vector.shape_cast %0 : vector<1x8x256xf32> to vector<8x256xf32>
    %c1 = arith.constant 1 : index
    %c0_2 = arith.constant 0 : index
    %c0_3 = arith.constant 0 : index
    %2 = vector.load %arg2[%c1, %c0_2, %c0_3] : memref<2x8x256xf32, #tpu.memory_space<vmem>>, vector<1x8x256xf32>
    %3 = vector.shape_cast %2 : vector<1x8x256xf32> to vector<8x256xf32>
    %4 = tpu.concatenate %1, %3 in 1 : vector<8x256xf32>, vector<8x256xf32> -> vector<8x512xf32>
    %c0_4 = arith.constant 0 : index
    %c0_5 = arith.constant 0 : index
    %5 = vector.load %arg4[%c0_4, %c0_5] : memref<32x16xf32, #tpu.memory_space<vmem>>, vector<32x16xf32>
    %c0_6 = arith.constant 0 : index
    %c0_7 = arith.constant 0 : index
    %6 = vector.load %arg5[%c0_6, %c0_7] : memref<32x1xf32, #tpu.memory_space<vmem>>, vector<32x1xf32>
    %c0_8 = arith.constant 0 : index
    %c0_9 = arith.constant 0 : index
    %c0_10 = arith.constant 0 : index
    %7 = vector.load %arg3[%c0_8, %c0_9, %c0_10] : memref<2x1x16xf32, #tpu.memory_space<vmem>>, vector<1x1x16xf32>
    %8 = vector.shape_cast %7 : vector<1x1x16xf32> to vector<1x16xf32>
    %9 = vector.broadcast %8 : vector<1x16xf32> to vector<32x16xf32>
    %10 = arith.mulf %5, %9 : vector<32x16xf32>
    %cst = arith.constant dense<0.000000e+00> : vector<32xf32>
    %11 = vector.multi_reduction <add>, %10, %cst [1] : vector<32x16xf32> to vector<32xf32>
    %12 = vector.shape_cast %11 : vector<32xf32> to vector<32x1xf32>
    %13 = arith.addf %12, %6 : vector<32x1xf32>
    %c1_11 = arith.constant 1 : index
    %c0_12 = arith.constant 0 : index
    %c0_13 = arith.constant 0 : index
    %14 = vector.load %arg3[%c1_11, %c0_12, %c0_13] : memref<2x1x16xf32, #tpu.memory_space<vmem>>, vector<1x1x16xf32>
    %15 = vector.shape_cast %14 : vector<1x1x16xf32> to vector<1x16xf32>
    %16 = vector.broadcast %15 : vector<1x16xf32> to vector<32x16xf32>
    %17 = arith.mulf %5, %16 : vector<32x16xf32>
    %cst_14 = arith.constant dense<0.000000e+00> : vector<32xf32>
    %18 = vector.multi_reduction <add>, %17, %cst_14 [1] : vector<32x16xf32> to vector<32xf32>
    %19 = vector.shape_cast %18 : vector<32xf32> to vector<32x1xf32>
    %20 = arith.addf %19, %6 : vector<32x1xf32>
    %21 = vector.extract_strided_slice %4 {offsets = [0, 0], sizes = [8, 256], strides = [1, 1]} : vector<8x512xf32> to vector<8x256xf32>
    %22 = vector.extract_strided_slice %13 {offsets = [0, 0], sizes = [8, 1], strides = [1, 1]} : vector<32x1xf32> to vector<8x1xf32>
    %23 = vector.extract_strided_slice %13 {offsets = [8, 0], sizes = [8, 1], strides = [1, 1]} : vector<32x1xf32> to vector<8x1xf32>
    %cst_15 = arith.constant dense<0.000000e+00> : vector<8xf32>
    %24 = vector.multi_reduction <add>, %21, %cst_15 [1] : vector<8x256xf32> to vector<8xf32>
    %25 = vector.shape_cast %24 : vector<8xf32> to vector<8x1xf32>
    %cst_16 = arith.constant 2.560000e+02 : f32
    %26 = vector.broadcast %cst_16 : f32 to vector<8x1xf32>
    %27 = arith.divf %25, %26 : vector<8x1xf32>
    %28 = vector.broadcast %27 : vector<8x1xf32> to vector<8x256xf32>
    %29 = arith.subf %21, %28 : vector<8x256xf32>
    %30 = arith.mulf %29, %29 : vector<8x256xf32>
    %cst_17 = arith.constant dense<0.000000e+00> : vector<8xf32>
    %31 = vector.multi_reduction <add>, %30, %cst_17 [1] : vector<8x256xf32> to vector<8xf32>
    %32 = vector.shape_cast %31 : vector<8xf32> to vector<8x1xf32>
    %cst_18 = arith.constant 2.560000e+02 : f32
    %33 = vector.broadcast %cst_18 : f32 to vector<8x1xf32>
    %34 = arith.divf %32, %33 : vector<8x1xf32>
    %cst_19 = arith.constant 1.000000e+00 : f32
    %35 = vector.broadcast %cst_19 : f32 to vector<8x1xf32>
    %36 = arith.addf %35, %22 : vector<8x1xf32>
    %37 = vector.broadcast %27 : vector<8x1xf32> to vector<8x256xf32>
    %38 = arith.subf %21, %37 : vector<8x256xf32>
    %cst_20 = arith.constant 9.99999974E-6 : f32
    %39 = vector.broadcast %cst_20 : f32 to vector<8x1xf32>
    %40 = arith.addf %34, %39 : vector<8x1xf32>
    %41 = math.rsqrt %40 : vector<8x1xf32>
    %42 = vector.broadcast %41 : vector<8x1xf32> to vector<8x256xf32>
    %43 = arith.mulf %38, %42 : vector<8x256xf32>
    %44 = vector.broadcast %36 : vector<8x1xf32> to vector<8x256xf32>
    %45 = arith.mulf %44, %43 : vector<8x256xf32>
    %46 = vector.broadcast %23 : vector<8x1xf32> to vector<8x256xf32>
    %47 = arith.addf %45, %46 : vector<8x256xf32>
    %cst_21 = arith.constant 0.000000e+00 : f32
    %48 = vector.broadcast %cst_21 : f32 to vector<8x256xf32>
    %49 = arith.cmpf oge, %47, %48 : vector<8x256xf32>
    %cst_22 = arith.constant 2.000000e-01 : f32
    %50 = vector.broadcast %cst_22 : f32 to vector<8x256xf32>
    %51 = arith.mulf %50, %47 : vector<8x256xf32>
    %52 = arith.select %49, %47, %51 : vector<8x256xi1>, vector<8x256xf32>
    %53 = vector.extract_strided_slice %4 {offsets = [0, 256], sizes = [8, 256], strides = [1, 1]} : vector<8x512xf32> to vector<8x256xf32>
    %54 = vector.extract_strided_slice %20 {offsets = [0, 0], sizes = [8, 1], strides = [1, 1]} : vector<32x1xf32> to vector<8x1xf32>
    %55 = vector.extract_strided_slice %20 {offsets = [8, 0], sizes = [8, 1], strides = [1, 1]} : vector<32x1xf32> to vector<8x1xf32>
    %cst_23 = arith.constant dense<0.000000e+00> : vector<8xf32>
    %56 = vector.multi_reduction <add>, %53, %cst_23 [1] : vector<8x256xf32> to vector<8xf32>
    %57 = vector.shape_cast %56 : vector<8xf32> to vector<8x1xf32>
    %cst_24 = arith.constant 2.560000e+02 : f32
    %58 = vector.broadcast %cst_24 : f32 to vector<8x1xf32>
    %59 = arith.divf %57, %58 : vector<8x1xf32>
    %60 = vector.broadcast %59 : vector<8x1xf32> to vector<8x256xf32>
    %61 = arith.subf %53, %60 : vector<8x256xf32>
    %62 = arith.mulf %61, %61 : vector<8x256xf32>
    %cst_25 = arith.constant dense<0.000000e+00> : vector<8xf32>
    %63 = vector.multi_reduction <add>, %62, %cst_25 [1] : vector<8x256xf32> to vector<8xf32>
    %64 = vector.shape_cast %63 : vector<8xf32> to vector<8x1xf32>
    %cst_26 = arith.constant 2.560000e+02 : f32
    %65 = vector.broadcast %cst_26 : f32 to vector<8x1xf32>
    %66 = arith.divf %64, %65 : vector<8x1xf32>
    %cst_27 = arith.constant 1.000000e+00 : f32
    %67 = vector.broadcast %cst_27 : f32 to vector<8x1xf32>
    %68 = arith.addf %67, %54 : vector<8x1xf32>
    %69 = vector.broadcast %59 : vector<8x1xf32> to vector<8x256xf32>
    %70 = arith.subf %53, %69 : vector<8x256xf32>
    %cst_28 = arith.constant 9.99999974E-6 : f32
    %71 = vector.broadcast %cst_28 : f32 to vector<8x1xf32>
    %72 = arith.addf %66, %71 : vector<8x1xf32>
    %73 = math.rsqrt %72 : vector<8x1xf32>
    %74 = vector.broadcast %73 : vector<8x1xf32> to vector<8x256xf32>
    %75 = arith.mulf %70, %74 : vector<8x256xf32>
    %76 = vector.broadcast %68 : vector<8x1xf32> to vector<8x256xf32>
    %77 = arith.mulf %76, %75 : vector<8x256xf32>
    %78 = vector.broadcast %55 : vector<8x1xf32> to vector<8x256xf32>
    %79 = arith.addf %77, %78 : vector<8x256xf32>
    %cst_29 = arith.constant 0.000000e+00 : f32
    %80 = vector.broadcast %cst_29 : f32 to vector<8x256xf32>
    %81 = arith.cmpf oge, %79, %80 : vector<8x256xf32>
    %cst_30 = arith.constant 2.000000e-01 : f32
    %82 = vector.broadcast %cst_30 : f32 to vector<8x256xf32>
    %83 = arith.mulf %82, %79 : vector<8x256xf32>
    %84 = arith.select %81, %79, %83 : vector<8x256xi1>, vector<8x256xf32>
    %85 = tpu.concatenate %52, %84 in 1 : vector<8x256xf32>, vector<8x256xf32> -> vector<8x512xf32>
    %c17_i32 = arith.constant 17 : i32
    %86 = tpu.dynamic_rotate %85 by %c17_i32 dim 1 : vector<8x512xf32>, i32 -> vector<8x512xf32>
    %c0_31 = arith.constant 0 : index
    %c0_32 = arith.constant 0 : index
    %c0_33 = arith.constant 0 : index
    %87 = vector.load %arg1[%c0_31, %c0_32, %c0_33] : memref<9x1x512xf32, #tpu.memory_space<vmem>>, vector<1x1x512xf32>
    %88 = vector.shape_cast %87 : vector<1x1x512xf32> to vector<1x512xf32>
    %89 = vector.broadcast %88 : vector<1x512xf32> to vector<8x512xf32>
    %90 = arith.mulf %86, %89 : vector<8x512xf32>
    %c0_34 = arith.constant 0 : index
    %c0_35 = arith.constant 0 : index
    %91 = vector.load %arg11[%c0_34, %c0_35] : memref<80x512xf32, #tpu.memory_space<vmem>>, vector<8x512xf32>
    tpu.vector_store %arg11[%c0_34, %c0_35], %90 {strides = array<i32>} : memref<80x512xf32, #tpu.memory_space<vmem>>, vector<8x512xf32>,
    %c16_i32 = arith.constant 16 : i32
    %92 = tpu.dynamic_rotate %85 by %c16_i32 dim 1 : vector<8x512xf32>, i32 -> vector<8x512xf32>
    %c1_36 = arith.constant 1 : index
    %c0_37 = arith.constant 0 : index
    %c0_38 = arith.constant 0 : index
    %93 = vector.load %arg1[%c1_36, %c0_37, %c0_38] : memref<9x1x512xf32, #tpu.memory_space<vmem>>, vector<1x1x512xf32>
    %94 = vector.shape_cast %93 : vector<1x1x512xf32> to vector<1x512xf32>
    %95 = vector.broadcast %94 : vector<1x512xf32> to vector<8x512xf32>
    %96 = arith.mulf %92, %95 : vector<8x512xf32>
    %c8 = arith.constant 8 : index
    %c0_39 = arith.constant 0 : index
    %97 = vector.load %arg11[%c8, %c0_39] : memref<80x512xf32, #tpu.memory_space<vmem>>, vector<8x512xf32>
    tpu.vector_store %arg11[%c8, %c0_39], %96 {strides = array<i32>} : memref<80x512xf32, #tpu.memory_space<vmem>>, vector<8x512xf32>,
    %c15_i32 = arith.constant 15 : i32
    %98 = tpu.dynamic_rotate %85 by %c15_i32 dim 1 : vector<8x512xf32>, i32 -> vector<8x512xf32>
    %c2 = arith.constant 2 : index
    %c0_40 = arith.constant 0 : index
    %c0_41 = arith.constant 0 : index
    %99 = vector.load %arg1[%c2, %c0_40, %c0_41] : memref<9x1x512xf32, #tpu.memory_space<vmem>>, vector<1x1x512xf32>
    %100 = vector.shape_cast %99 : vector<1x1x512xf32> to vector<1x512xf32>
    %101 = vector.broadcast %100 : vector<1x512xf32> to vector<8x512xf32>
    %102 = arith.mulf %98, %101 : vector<8x512xf32>
    %c16 = arith.constant 16 : index
    %c0_42 = arith.constant 0 : index
    %103 = vector.load %arg11[%c16, %c0_42] : memref<80x512xf32, #tpu.memory_space<vmem>>, vector<8x512xf32>
    tpu.vector_store %arg11[%c16, %c0_42], %102 {strides = array<i32>} : memref<80x512xf32, #tpu.memory_space<vmem>>, vector<8x512xf32>,
    %c1_i32 = arith.constant 1 : i32
    %104 = tpu.dynamic_rotate %85 by %c1_i32 dim 1 : vector<8x512xf32>, i32 -> vector<8x512xf32>
    %c3 = arith.constant 3 : index
    %c0_43 = arith.constant 0 : index
    %c0_44 = arith.constant 0 : index
    %105 = vector.load %arg1[%c3, %c0_43, %c0_44] : memref<9x1x512xf32, #tpu.memory_space<vmem>>, vector<1x1x512xf32>
    %106 = vector.shape_cast %105 : vector<1x1x512xf32> to vector<1x512xf32>
    %107 = vector.broadcast %106 : vector<1x512xf32> to vector<8x512xf32>
    %108 = arith.mulf %104, %107 : vector<8x512xf32>
    %c24 = arith.constant 24 : index
    %c0_45 = arith.constant 0 : index
    %109 = vector.load %arg11[%c24, %c0_45] : memref<80x512xf32, #tpu.memory_space<vmem>>, vector<8x512xf32>
    tpu.vector_store %arg11[%c24, %c0_45], %108 {strides = array<i32>} : memref<80x512xf32, #tpu.memory_space<vmem>>, vector<8x512xf32>,
    %c32 = arith.constant 32 : index
    %c0_46 = arith.constant 0 : index
    %110 = vector.load %arg11[%c32, %c0_46] : memref<80x512xf32, #tpu.memory_space<vmem>>, vector<8x512xf32>
    tpu.vector_store %arg11[%c32, %c0_46], %85 {strides = array<i32>} : memref<80x512xf32, #tpu.memory_space<vmem>>, vector<8x512xf32>,
    %c511_i32 = arith.constant 511 : i32
    %111 = tpu.dynamic_rotate %85 by %c511_i32 dim 1 : vector<8x512xf32>, i32 -> vector<8x512xf32>
    %c5 = arith.constant 5 : index
    %c0_47 = arith.constant 0 : index
    %c0_48 = arith.constant 0 : index
    %112 = vector.load %arg1[%c5, %c0_47, %c0_48] : memref<9x1x512xf32, #tpu.memory_space<vmem>>, vector<1x1x512xf32>
    %113 = vector.shape_cast %112 : vector<1x1x512xf32> to vector<1x512xf32>
    %114 = vector.broadcast %113 : vector<1x512xf32> to vector<8x512xf32>
    %115 = arith.mulf %111, %114 : vector<8x512xf32>
    %c40 = arith.constant 40 : index
    %c0_49 = arith.constant 0 : index
    %116 = vector.load %arg11[%c40, %c0_49] : memref<80x512xf32, #tpu.memory_space<vmem>>, vector<8x512xf32>
    tpu.vector_store %arg11[%c40, %c0_49], %115 {strides = array<i32>} : memref<80x512xf32, #tpu.memory_space<vmem>>, vector<8x512xf32>,
    %c497_i32 = arith.constant 497 : i32
    %117 = tpu.dynamic_rotate %85 by %c497_i32 dim 1 : vector<8x512xf32>, i32 -> vector<8x512xf32>
    %c6 = arith.constant 6 : index
    %c0_50 = arith.constant 0 : index
    %c0_51 = arith.constant 0 : index
    %118 = vector.load %arg1[%c6, %c0_50, %c0_51] : memref<9x1x512xf32, #tpu.memory_space<vmem>>, vector<1x1x512xf32>
    %119 = vector.shape_cast %118 : vector<1x1x512xf32> to vector<1x512xf32>
    %120 = vector.broadcast %119 : vector<1x512xf32> to vector<8x512xf32>
    %121 = arith.mulf %117, %120 : vector<8x512xf32>
    %c48 = arith.constant 48 : index
    %c0_52 = arith.constant 0 : index
    %122 = vector.load %arg11[%c48, %c0_52] : memref<80x512xf32, #tpu.memory_space<vmem>>, vector<8x512xf32>
    tpu.vector_store %arg11[%c48, %c0_52], %121 {strides = array<i32>} : memref<80x512xf32, #tpu.memory_space<vmem>>, vector<8x512xf32>,
    %c496_i32 = arith.constant 496 : i32
    %123 = tpu.dynamic_rotate %85 by %c496_i32 dim 1 : vector<8x512xf32>, i32 -> vector<8x512xf32>
    %c7 = arith.constant 7 : index
    %c0_53 = arith.constant 0 : index
    %c0_54 = arith.constant 0 : index
    %124 = vector.load %arg1[%c7, %c0_53, %c0_54] : memref<9x1x512xf32, #tpu.memory_space<vmem>>, vector<1x1x512xf32>
    %125 = vector.shape_cast %124 : vector<1x1x512xf32> to vector<1x512xf32>
    %126 = vector.broadcast %125 : vector<1x512xf32> to vector<8x512xf32>
    %127 = arith.mulf %123, %126 : vector<8x512xf32>
    %c56 = arith.constant 56 : index
    %c0_55 = arith.constant 0 : index
    %128 = vector.load %arg11[%c56, %c0_55] : memref<80x512xf32, #tpu.memory_space<vmem>>, vector<8x512xf32>
    tpu.vector_store %arg11[%c56, %c0_55], %127 {strides = array<i32>} : memref<80x512xf32, #tpu.memory_space<vmem>>, vector<8x512xf32>,
    %c495_i32 = arith.constant 495 : i32
    %129 = tpu.dynamic_rotate %85 by %c495_i32 dim 1 : vector<8x512xf32>, i32 -> vector<8x512xf32>
    %c8_56 = arith.constant 8 : index
    %c0_57 = arith.constant 0 : index
    %c0_58 = arith.constant 0 : index
    %130 = vector.load %arg1[%c8_56, %c0_57, %c0_58] : memref<9x1x512xf32, #tpu.memory_space<vmem>>, vector<1x1x512xf32>
    %131 = vector.shape_cast %130 : vector<1x1x512xf32> to vector<1x512xf32>
    %132 = vector.broadcast %131 : vector<1x512xf32> to vector<8x512xf32>
    %133 = arith.mulf %129, %132 : vector<8x512xf32>
    %c64 = arith.constant 64 : index
    %c0_59 = arith.constant 0 : index
    %134 = vector.load %arg11[%c64, %c0_59] : memref<80x512xf32, #tpu.memory_space<vmem>>, vector<8x512xf32>
    tpu.vector_store %arg11[%c64, %c0_59], %133 {strides = array<i32>} : memref<80x512xf32, #tpu.memory_space<vmem>>, vector<8x512xf32>,
    %c0_60 = arith.constant 0 : index
    %c0_61 = arith.constant 0 : index
    %135 = vector.load %arg6[%c0_60, %c0_61] : memref<8x72xf32, #tpu.memory_space<vmem>>, vector<8x72xf32>
    %c0_62 = arith.constant 0 : index
    %c0_63 = arith.constant 0 : index
    %136 = vector.load %arg11[%c0_62, %c0_63] : memref<80x512xf32, #tpu.memory_space<vmem>>, vector<72x512xf32>
    %cst_64 = arith.constant dense<0.000000e+00> : vector<8x512xf32>
    %137 = tpu.matmul %135, %136, %cst_64 {dimension_numbers = #tpu.dot_dimension_numbers<[1], [0], [0], [1], [0, 0, 1, 1], [], []>} : vector<8x72xf32>, vector<72x512xf32>, vector<8x512xf32> -> vector<8x512xf32>
    %c0_65 = arith.constant 0 : index
    %c0_66 = arith.constant 0 : index
    %138 = vector.load %arg7[%c0_65, %c0_66] : memref<8x1xf32, #tpu.memory_space<vmem>>, vector<8x1xf32>
    %139 = vector.broadcast %138 : vector<8x1xf32> to vector<8x512xf32>
    %140 = arith.addf %137, %139 : vector<8x512xf32>
    %141 = vector.extract_strided_slice %140 {offsets = [0, 0], sizes = [8, 256], strides = [1, 1]} : vector<8x512xf32> to vector<8x256xf32>
    %142 = vector.extract_strided_slice %13 {offsets = [16, 0], sizes = [8, 1], strides = [1, 1]} : vector<32x1xf32> to vector<8x1xf32>
    %143 = vector.extract_strided_slice %13 {offsets = [24, 0], sizes = [8, 1], strides = [1, 1]} : vector<32x1xf32> to vector<8x1xf32>
    %cst_67 = arith.constant dense<0.000000e+00> : vector<8xf32>
    %144 = vector.multi_reduction <add>, %141, %cst_67 [1] : vector<8x256xf32> to vector<8xf32>
    %145 = vector.shape_cast %144 : vector<8xf32> to vector<8x1xf32>
    %cst_68 = arith.constant 2.560000e+02 : f32
    %146 = vector.broadcast %cst_68 : f32 to vector<8x1xf32>
    %147 = arith.divf %145, %146 : vector<8x1xf32>
    %148 = vector.broadcast %147 : vector<8x1xf32> to vector<8x256xf32>
    %149 = arith.subf %141, %148 : vector<8x256xf32>
    %150 = arith.mulf %149, %149 : vector<8x256xf32>
    %cst_69 = arith.constant dense<0.000000e+00> : vector<8xf32>
    %151 = vector.multi_reduction <add>, %150, %cst_69 [1] : vector<8x256xf32> to vector<8xf32>
    %152 = vector.shape_cast %151 : vector<8xf32> to vector<8x1xf32>
    %cst_70 = arith.constant 2.560000e+02 : f32
    %153 = vector.broadcast %cst_70 : f32 to vector<8x1xf32>
    %154 = arith.divf %152, %153 : vector<8x1xf32>
    %cst_71 = arith.constant 1.000000e+00 : f32
    %155 = vector.broadcast %cst_71 : f32 to vector<8x1xf32>
    %156 = arith.addf %155, %142 : vector<8x1xf32>
    %157 = vector.broadcast %147 : vector<8x1xf32> to vector<8x256xf32>
    %158 = arith.subf %141, %157 : vector<8x256xf32>
    %cst_72 = arith.constant 9.99999974E-6 : f32
    %159 = vector.broadcast %cst_72 : f32 to vector<8x1xf32>
    %160 = arith.addf %154, %159 : vector<8x1xf32>
    %161 = math.rsqrt %160 : vector<8x1xf32>
    %162 = vector.broadcast %161 : vector<8x1xf32> to vector<8x256xf32>
    %163 = arith.mulf %158, %162 : vector<8x256xf32>
    %164 = vector.broadcast %156 : vector<8x1xf32> to vector<8x256xf32>
    %165 = arith.mulf %164, %163 : vector<8x256xf32>
    %166 = vector.broadcast %143 : vector<8x1xf32> to vector<8x256xf32>
    %167 = arith.addf %165, %166 : vector<8x256xf32>
    %cst_73 = arith.constant 0.000000e+00 : f32
    %168 = vector.broadcast %cst_73 : f32 to vector<8x256xf32>
    %169 = arith.cmpf oge, %167, %168 : vector<8x256xf32>
    %cst_74 = arith.constant 2.000000e-01 : f32
    %170 = vector.broadcast %cst_74 : f32 to vector<8x256xf32>
    %171 = arith.mulf %170, %167 : vector<8x256xf32>
    %172 = arith.select %169, %167, %171 : vector<8x256xi1>, vector<8x256xf32>
    %173 = vector.extract_strided_slice %140 {offsets = [0, 256], sizes = [8, 256], strides = [1, 1]} : vector<8x512xf32> to vector<8x256xf32>
    %174 = vector.extract_strided_slice %20 {offsets = [16, 0], sizes = [8, 1], strides = [1, 1]} : vector<32x1xf32> to vector<8x1xf32>
    %175 = vector.extract_strided_slice %20 {offsets = [24, 0], sizes = [8, 1], strides = [1, 1]} : vector<32x1xf32> to vector<8x1xf32>
    %cst_75 = arith.constant dense<0.000000e+00> : vector<8xf32>
    %176 = vector.multi_reduction <add>, %173, %cst_75 [1] : vector<8x256xf32> to vector<8xf32>
    %177 = vector.shape_cast %176 : vector<8xf32> to vector<8x1xf32>
    %cst_76 = arith.constant 2.560000e+02 : f32
    %178 = vector.broadcast %cst_76 : f32 to vector<8x1xf32>
    %179 = arith.divf %177, %178 : vector<8x1xf32>
    %180 = vector.broadcast %179 : vector<8x1xf32> to vector<8x256xf32>
    %181 = arith.subf %173, %180 : vector<8x256xf32>
    %182 = arith.mulf %181, %181 : vector<8x256xf32>
    %cst_77 = arith.constant dense<0.000000e+00> : vector<8xf32>
    %183 = vector.multi_reduction <add>, %182, %cst_77 [1] : vector<8x256xf32> to vector<8xf32>
    %184 = vector.shape_cast %183 : vector<8xf32> to vector<8x1xf32>
    %cst_78 = arith.constant 2.560000e+02 : f32
    %185 = vector.broadcast %cst_78 : f32 to vector<8x1xf32>
    %186 = arith.divf %184, %185 : vector<8x1xf32>
    %cst_79 = arith.constant 1.000000e+00 : f32
    %187 = vector.broadcast %cst_79 : f32 to vector<8x1xf32>
    %188 = arith.addf %187, %174 : vector<8x1xf32>
    %189 = vector.broadcast %179 : vector<8x1xf32> to vector<8x256xf32>
    %190 = arith.subf %173, %189 : vector<8x256xf32>
    %cst_80 = arith.constant 9.99999974E-6 : f32
    %191 = vector.broadcast %cst_80 : f32 to vector<8x1xf32>
    %192 = arith.addf %186, %191 : vector<8x1xf32>
    %193 = math.rsqrt %192 : vector<8x1xf32>
    %194 = vector.broadcast %193 : vector<8x1xf32> to vector<8x256xf32>
    %195 = arith.mulf %190, %194 : vector<8x256xf32>
    %196 = vector.broadcast %188 : vector<8x1xf32> to vector<8x256xf32>
    %197 = arith.mulf %196, %195 : vector<8x256xf32>
    %198 = vector.broadcast %175 : vector<8x1xf32> to vector<8x256xf32>
    %199 = arith.addf %197, %198 : vector<8x256xf32>
    %cst_81 = arith.constant 0.000000e+00 : f32
    %200 = vector.broadcast %cst_81 : f32 to vector<8x256xf32>
    %201 = arith.cmpf oge, %199, %200 : vector<8x256xf32>
    %cst_82 = arith.constant 2.000000e-01 : f32
    %202 = vector.broadcast %cst_82 : f32 to vector<8x256xf32>
    %203 = arith.mulf %202, %199 : vector<8x256xf32>
    %204 = arith.select %201, %199, %203 : vector<8x256xi1>, vector<8x256xf32>
    %205 = tpu.concatenate %172, %204 in 1 : vector<8x256xf32>, vector<8x256xf32> -> vector<8x512xf32>
    %c72 = arith.constant 72 : index
    %c0_83 = arith.constant 0 : index
    %206 = vector.load %arg11[%c72, %c0_83] : memref<80x512xf32, #tpu.memory_space<vmem>>, vector<8x512xf32>
    tpu.vector_store %arg11[%c72, %c0_83], %4 {strides = array<i32>} : memref<80x512xf32, #tpu.memory_space<vmem>>, vector<8x512xf32>,
    %c17_i32_84 = arith.constant 17 : i32
    %207 = tpu.dynamic_rotate %205 by %c17_i32_84 dim 1 : vector<8x512xf32>, i32 -> vector<8x512xf32>
    %c0_85 = arith.constant 0 : index
    %c0_86 = arith.constant 0 : index
    %c0_87 = arith.constant 0 : index
    %208 = vector.load %arg1[%c0_85, %c0_86, %c0_87] : memref<9x1x512xf32, #tpu.memory_space<vmem>>, vector<1x1x512xf32>
    %209 = vector.shape_cast %208 : vector<1x1x512xf32> to vector<1x512xf32>
    %210 = vector.broadcast %209 : vector<1x512xf32> to vector<8x512xf32>
    %211 = arith.mulf %207, %210 : vector<8x512xf32>
    %c0_88 = arith.constant 0 : index
    %c0_89 = arith.constant 0 : index
    %212 = vector.load %arg11[%c0_88, %c0_89] : memref<80x512xf32, #tpu.memory_space<vmem>>, vector<8x512xf32>
    tpu.vector_store %arg11[%c0_88, %c0_89], %211 {strides = array<i32>} : memref<80x512xf32, #tpu.memory_space<vmem>>, vector<8x512xf32>,
    %c16_i32_90 = arith.constant 16 : i32
    %213 = tpu.dynamic_rotate %205 by %c16_i32_90 dim 1 : vector<8x512xf32>, i32 -> vector<8x512xf32>
    %c1_91 = arith.constant 1 : index
    %c0_92 = arith.constant 0 : index
    %c0_93 = arith.constant 0 : index
    %214 = vector.load %arg1[%c1_91, %c0_92, %c0_93] : memref<9x1x512xf32, #tpu.memory_space<vmem>>, vector<1x1x512xf32>
    %215 = vector.shape_cast %214 : vector<1x1x512xf32> to vector<1x512xf32>
    %216 = vector.broadcast %215 : vector<1x512xf32> to vector<8x512xf32>
    %217 = arith.mulf %213, %216 : vector<8x512xf32>
    %c8_94 = arith.constant 8 : index
    %c0_95 = arith.constant 0 : index
    %218 = vector.load %arg11[%c8_94, %c0_95] : memref<80x512xf32, #tpu.memory_space<vmem>>, vector<8x512xf32>
    tpu.vector_store %arg11[%c8_94, %c0_95], %217 {strides = array<i32>} : memref<80x512xf32, #tpu.memory_space<vmem>>, vector<8x512xf32>,
    %c15_i32_96 = arith.constant 15 : i32
    %219 = tpu.dynamic_rotate %205 by %c15_i32_96 dim 1 : vector<8x512xf32>, i32 -> vector<8x512xf32>
    %c2_97 = arith.constant 2 : index
    %c0_98 = arith.constant 0 : index
    %c0_99 = arith.constant 0 : index
    %220 = vector.load %arg1[%c2_97, %c0_98, %c0_99] : memref<9x1x512xf32, #tpu.memory_space<vmem>>, vector<1x1x512xf32>
    %221 = vector.shape_cast %220 : vector<1x1x512xf32> to vector<1x512xf32>
    %222 = vector.broadcast %221 : vector<1x512xf32> to vector<8x512xf32>
    %223 = arith.mulf %219, %222 : vector<8x512xf32>
    %c16_100 = arith.constant 16 : index
    %c0_101 = arith.constant 0 : index
    %224 = vector.load %arg11[%c16_100, %c0_101] : memref<80x512xf32, #tpu.memory_space<vmem>>, vector<8x512xf32>
    tpu.vector_store %arg11[%c16_100, %c0_101], %223 {strides = array<i32>} : memref<80x512xf32, #tpu.memory_space<vmem>>, vector<8x512xf32>,
    %c1_i32_102 = arith.constant 1 : i32
    %225 = tpu.dynamic_rotate %205 by %c1_i32_102 dim 1 : vector<8x512xf32>, i32 -> vector<8x512xf32>
    %c3_103 = arith.constant 3 : index
    %c0_104 = arith.constant 0 : index
    %c0_105 = arith.constant 0 : index
    %226 = vector.load %arg1[%c3_103, %c0_104, %c0_105] : memref<9x1x512xf32, #tpu.memory_space<vmem>>, vector<1x1x512xf32>
    %227 = vector.shape_cast %226 : vector<1x1x512xf32> to vector<1x512xf32>
    %228 = vector.broadcast %227 : vector<1x512xf32> to vector<8x512xf32>
    %229 = arith.mulf %225, %228 : vector<8x512xf32>
    %c24_106 = arith.constant 24 : index
    %c0_107 = arith.constant 0 : index
    %230 = vector.load %arg11[%c24_106, %c0_107] : memref<80x512xf32, #tpu.memory_space<vmem>>, vector<8x512xf32>
    tpu.vector_store %arg11[%c24_106, %c0_107], %229 {strides = array<i32>} : memref<80x512xf32, #tpu.memory_space<vmem>>, vector<8x512xf32>,
    %c32_108 = arith.constant 32 : index
    %c0_109 = arith.constant 0 : index
    %231 = vector.load %arg11[%c32_108, %c0_109] : memref<80x512xf32, #tpu.memory_space<vmem>>, vector<8x512xf32>
    tpu.vector_store %arg11[%c32_108, %c0_109], %205 {strides = array<i32>} : memref<80x512xf32, #tpu.memory_space<vmem>>, vector<8x512xf32>,
    %c511_i32_110 = arith.constant 511 : i32
    %232 = tpu.dynamic_rotate %205 by %c511_i32_110 dim 1 : vector<8x512xf32>, i32 -> vector<8x512xf32>
    %c5_111 = arith.constant 5 : index
    %c0_112 = arith.constant 0 : index
    %c0_113 = arith.constant 0 : index
    %233 = vector.load %arg1[%c5_111, %c0_112, %c0_113] : memref<9x1x512xf32, #tpu.memory_space<vmem>>, vector<1x1x512xf32>
    %234 = vector.shape_cast %233 : vector<1x1x512xf32> to vector<1x512xf32>
    %235 = vector.broadcast %234 : vector<1x512xf32> to vector<8x512xf32>
    %236 = arith.mulf %232, %235 : vector<8x512xf32>
    %c40_114 = arith.constant 40 : index
    %c0_115 = arith.constant 0 : index
    %237 = vector.load %arg11[%c40_114, %c0_115] : memref<80x512xf32, #tpu.memory_space<vmem>>, vector<8x512xf32>
    tpu.vector_store %arg11[%c40_114, %c0_115], %236 {strides = array<i32>} : memref<80x512xf32, #tpu.memory_space<vmem>>, vector<8x512xf32>,
    %c497_i32_116 = arith.constant 497 : i32
    %238 = tpu.dynamic_rotate %205 by %c497_i32_116 dim 1 : vector<8x512xf32>, i32 -> vector<8x512xf32>
    %c6_117 = arith.constant 6 : index
    %c0_118 = arith.constant 0 : index
    %c0_119 = arith.constant 0 : index
    %239 = vector.load %arg1[%c6_117, %c0_118, %c0_119] : memref<9x1x512xf32, #tpu.memory_space<vmem>>, vector<1x1x512xf32>
    %240 = vector.shape_cast %239 : vector<1x1x512xf32> to vector<1x512xf32>
    %241 = vector.broadcast %240 : vector<1x512xf32> to vector<8x512xf32>
    %242 = arith.mulf %238, %241 : vector<8x512xf32>
    %c48_120 = arith.constant 48 : index
    %c0_121 = arith.constant 0 : index
    %243 = vector.load %arg11[%c48_120, %c0_121] : memref<80x512xf32, #tpu.memory_space<vmem>>, vector<8x512xf32>
    tpu.vector_store %arg11[%c48_120, %c0_121], %242 {strides = array<i32>} : memref<80x512xf32, #tpu.memory_space<vmem>>, vector<8x512xf32>,
    %c496_i32_122 = arith.constant 496 : i32
    %244 = tpu.dynamic_rotate %205 by %c496_i32_122 dim 1 : vector<8x512xf32>, i32 -> vector<8x512xf32>
    %c7_123 = arith.constant 7 : index
    %c0_124 = arith.constant 0 : index
    %c0_125 = arith.constant 0 : index
    %245 = vector.load %arg1[%c7_123, %c0_124, %c0_125] : memref<9x1x512xf32, #tpu.memory_space<vmem>>, vector<1x1x512xf32>
    %246 = vector.shape_cast %245 : vector<1x1x512xf32> to vector<1x512xf32>
    %247 = vector.broadcast %246 : vector<1x512xf32> to vector<8x512xf32>
    %248 = arith.mulf %244, %247 : vector<8x512xf32>
    %c56_126 = arith.constant 56 : index
    %c0_127 = arith.constant 0 : index
    %249 = vector.load %arg11[%c56_126, %c0_127] : memref<80x512xf32, #tpu.memory_space<vmem>>, vector<8x512xf32>
    tpu.vector_store %arg11[%c56_126, %c0_127], %248 {strides = array<i32>} : memref<80x512xf32, #tpu.memory_space<vmem>>, vector<8x512xf32>,
    %c495_i32_128 = arith.constant 495 : i32
    %250 = tpu.dynamic_rotate %205 by %c495_i32_128 dim 1 : vector<8x512xf32>, i32 -> vector<8x512xf32>
    %c8_129 = arith.constant 8 : index
    %c0_130 = arith.constant 0 : index
    %c0_131 = arith.constant 0 : index
    %251 = vector.load %arg1[%c8_129, %c0_130, %c0_131] : memref<9x1x512xf32, #tpu.memory_space<vmem>>, vector<1x1x512xf32>
    %252 = vector.shape_cast %251 : vector<1x1x512xf32> to vector<1x512xf32>
    %253 = vector.broadcast %252 : vector<1x512xf32> to vector<8x512xf32>
    %254 = arith.mulf %250, %253 : vector<8x512xf32>
    %c64_132 = arith.constant 64 : index
    %c0_133 = arith.constant 0 : index
    %255 = vector.load %arg11[%c64_132, %c0_133] : memref<80x512xf32, #tpu.memory_space<vmem>>, vector<8x512xf32>
    tpu.vector_store %arg11[%c64_132, %c0_133], %254 {strides = array<i32>} : memref<80x512xf32, #tpu.memory_space<vmem>>, vector<8x512xf32>,
    %c0_134 = arith.constant 0 : index
    %c0_135 = arith.constant 0 : index
    %256 = vector.load %arg8[%c0_134, %c0_135] : memref<8x80xf32, #tpu.memory_space<vmem>>, vector<8x80xf32>
    %c0_136 = arith.constant 0 : index
    %c0_137 = arith.constant 0 : index
    %257 = vector.load %arg11[%c0_136, %c0_137] : memref<80x512xf32, #tpu.memory_space<vmem>>, vector<80x512xf32>
    %cst_138 = arith.constant dense<0.000000e+00> : vector<8x512xf32>
    %258 = tpu.matmul %256, %257, %cst_138 {dimension_numbers = #tpu.dot_dimension_numbers<[1], [0], [0], [1], [0, 0, 1, 1], [], []>} : vector<8x80xf32>, vector<80x512xf32>, vector<8x512xf32> -> vector<8x512xf32>
    %c0_139 = arith.constant 0 : index
    %c0_140 = arith.constant 0 : index
    %259 = vector.load %arg9[%c0_139, %c0_140] : memref<8x1xf32, #tpu.memory_space<vmem>>, vector<8x1xf32>
    %260 = vector.broadcast %259 : vector<8x1xf32> to vector<8x512xf32>
    %261 = arith.addf %258, %260 : vector<8x512xf32>
    %cst_141 = arith.constant 0.707106769 : f32
    %262 = vector.broadcast %cst_141 : f32 to vector<8x512xf32>
    %263 = arith.mulf %261, %262 : vector<8x512xf32>
    %264 = vector.extract_strided_slice %263 {offsets = [0, 0], sizes = [8, 256], strides = [1, 1]} : vector<8x512xf32> to vector<8x256xf32>
    %c0_142 = arith.constant 0 : index
    %c0_143 = arith.constant 0 : index
    %c0_144 = arith.constant 0 : index
    %265 = vector.load %arg10[%c0_142, %c0_143, %c0_144] : memref<2x8x256xf32, #tpu.memory_space<vmem>>, vector<1x8x256xf32>
    %266 = vector.shape_cast %265 : vector<1x8x256xf32> to vector<8x256xf32>
    %267 = vector.shape_cast %264 : vector<8x256xf32> to vector<1x8x256xf32>
    tpu.vector_store %arg10[%c0_142, %c0_143, %c0_144], %267 {strides = array<i32>} : memref<2x8x256xf32, #tpu.memory_space<vmem>>, vector<1x8x256xf32>,
    %268 = vector.extract_strided_slice %263 {offsets = [0, 256], sizes = [8, 256], strides = [1, 1]} : vector<8x512xf32> to vector<8x256xf32>
    %c1_145 = arith.constant 1 : index
    %c0_146 = arith.constant 0 : index
    %c0_147 = arith.constant 0 : index
    %269 = vector.load %arg10[%c1_145, %c0_146, %c0_147] : memref<2x8x256xf32, #tpu.memory_space<vmem>>, vector<1x8x256xf32>
    %270 = vector.shape_cast %269 : vector<1x8x256xf32> to vector<8x256xf32>
    %271 = vector.shape_cast %268 : vector<8x256xf32> to vector<1x8x256xf32>
    tpu.vector_store %arg10[%c1_145, %c0_146, %c0_147], %271 {strides = array<i32>} : memref<2x8x256xf32, #tpu.memory_space<vmem>>, vector<1x8x256xf32>,
    return
  }
  func.func @transform_0(%arg0: i32) -> (i32, i32, i32) {
    %c0_i32 = arith.constant 0 : i32
    %c0_i32_0 = arith.constant 0 : i32
    %c0_i32_1 = arith.constant 0 : i32
    %c0_i32_2 = arith.constant 0 : i32
    return %c0_i32, %c0_i32_0, %c0_i32_1 : i32, i32, i32
  }
  func.func @transform_1(%arg0: i32) -> (i32, i32, i32) {
    %c0_i32 = arith.constant 0 : i32
    %c0_i32_0 = arith.constant 0 : i32
    %c0_i32_1 = arith.constant 0 : i32
    return %arg0, %c0_i32, %c0_i32_0 : i32, i32, i32
  }
  func.func @transform_2(%arg0: i32) -> (i32, i32, i32) {
    %c0_i32 = arith.constant 0 : i32
    %c0_i32_0 = arith.constant 0 : i32
    %c0_i32_1 = arith.constant 0 : i32
    return %arg0, %c0_i32, %c0_i32_0 : i32, i32, i32
  }
  func.func @transform_3(%arg0: i32) -> (i32, i32) {
    %c0_i32 = arith.constant 0 : i32
    %c0_i32_0 = arith.constant 0 : i32
    %c0_i32_1 = arith.constant 0 : i32
    return %c0_i32, %c0_i32_0 : i32, i32
  }
  func.func @transform_4(%arg0: i32) -> (i32, i32) {
    %c0_i32 = arith.constant 0 : i32
    %c0_i32_0 = arith.constant 0 : i32
    %c0_i32_1 = arith.constant 0 : i32
    return %c0_i32, %c0_i32_0 : i32, i32
  }
  func.func @transform_5(%arg0: i32) -> (i32, i32) {
    %c0_i32 = arith.constant 0 : i32
    %c0_i32_0 = arith.constant 0 : i32
    %c0_i32_1 = arith.constant 0 : i32
    return %c0_i32, %c0_i32_0 : i32, i32
  }
  func.func @transform_6(%arg0: i32) -> (i32, i32) {
    %c0_i32 = arith.constant 0 : i32
    %c0_i32_0 = arith.constant 0 : i32
    %c0_i32_1 = arith.constant 0 : i32
    return %c0_i32, %c0_i32_0 : i32, i32
  }
  func.func @transform_7(%arg0: i32) -> (i32, i32) {
    %c0_i32 = arith.constant 0 : i32
    %c0_i32_0 = arith.constant 0 : i32
    %c0_i32_1 = arith.constant 0 : i32
    return %c0_i32, %c0_i32_0 : i32, i32
  }
  func.func @transform_8(%arg0: i32) -> (i32, i32) {
    %c0_i32 = arith.constant 0 : i32
    %c0_i32_0 = arith.constant 0 : i32
    %c0_i32_1 = arith.constant 0 : i32
    return %c0_i32, %c0_i32_0 : i32, i32
  }
  func.func @transform_9(%arg0: i32) -> (i32, i32, i32) {
    %c0_i32 = arith.constant 0 : i32
    %c0_i32_0 = arith.constant 0 : i32
    %c0_i32_1 = arith.constant 0 : i32
    return %arg0, %c0_i32, %c0_i32_0 : i32, i32, i32
  }
}

</mosaic_0001>

<bundles_post_ra>
// kernel: tpu_custom_call.1
= control target key start
LH: loop header
LB: loop body
LE: loop exit
PB: predicated region body
PF: predicated region fallthrough
CT: control target
= control target key end

     0   :  { %14 = vsyncpa [#allocation4], 0  ;;  %s2799_s0 = inlined_call_operand.vmem [shape: f32[9,1,512], index: 0, kind: input, shape index: {}]   ;;  %s2800_s1 = inlined_call_operand.vmem [shape: f32[4,8,256], index: 1, kind: input, shape index: {}]   ;;  %s2801_s2 = inlined_call_operand.hbm [shape: f32[4,1,16], index: 2, kind: input, shape index: {}]   ;;  %s2802_s3 = inlined_call_operand.vmem [shape: f32[32,16], index: 3, kind: input, shape index: {}]   ;;  %s2803_s4 = inlined_call_operand.vmem [shape: f32[32,1], index: 4, kind: input, shape index: {}]   ;;  %s2804_s5 = inlined_call_operand.vmem [shape: f32[8,72], index: 5, kind: input, shape index: {}]   ;;  %s2805_s6 = inlined_call_operand.vmem [shape: f32[8,1], index: 6, kind: input, shape index: {}]   ;;  %s2806_s7 = inlined_call_operand.vmem [shape: f32[8,80], index: 7, kind: input, shape index: {}]   ;;  %s2807_s8 = inlined_call_operand.vmem [shape: f32[8,1], index: 8, kind: input, shape index: {}]   ;;  %s2808_s9 = inlined_call_operand.hbm [shape: f32[4,8,256], index: 9, kind: output, shape index: {}]  }
   0x1   :  { %16 = vsyncpa [#allocation4 + $0x1], 0 }
   0x2   :  { %17 = vsyncpa [#allocation5], 0 }
   0x3   :  { %19 = vsyncpa [#allocation5 + $0x1], 0  ;;  %s2143_s30 = smov 0   ;;  %s2145_s10 = smov 0  }
   0x4   :  { %s2147_s11 = smov 0   ;;  %s2149_s12 = smov 0  }
   0x5 LB: > { %s2164_s13 = sadd.s32 4294967295, %s2076_s12   ;;  %s1788_s14 = sadd.s32 4294967294, %s2076_s12   ;;  %s2076_s12 = sphi %s2149_s12, %s2827_s12   ;;  %s2072_s11 = sphi %s2147_s11, %s2826_s11   ;;  %s2068_s10 = sphi %s2145_s10, %s2825_s10   ;;  %s2064_s30 = sphi %s2143_s30, %s2824_s30  }
   0x6   : > { %s2168_s15 = sadd.s32 1, %s2076_s12   ;;  %s79_s16 = sadd.s32 1, %s2072_s11 }
   0x7   : > { %s76_s17 = ssub.s32 %s2076_s12, %s2168_s15  ;;  %p86_p0 = scmp.ne.s32.totalorder %s2072_s11, %s2068_s10 }
   0x8   : > { %p77_p1 = scmp.eq.s32.totalorder %s76_s17, 0  ;;  %p87_p2 = scmp.eq.s32.totalorder %s2076_s12, 0 }
   0x9   : > { %p92_p3 = scmp.ne.s32.totalorder %s2068_s10, %s2064_s30  ;;  %p93_p4 = scmp.eq.s32.totalorder %s2164_s13, 0 }
   0xa   : > { %s2180_s18 = scalar_select %p77_p1, %s2072_s11, %s79_s16  }
   0xb   : > { %p2182_p5 = por %p87_p2, %p86_p0  ;;  %p2186_p6 = por %p93_p4, %p92_p3 }
   0xc   : > { %p242_p7 = scmp.eq.s32.totalorder %s2164_s13, 1  ;;  %p248_p8 = scmp.eq.s32.totalorder %s1788_s14, 1 }
   0xd   : > { %p1919_p10 = scmp.lt.s32.totalorder %s2076_s12, 2  ;;  %s299_s23 = sand.u32 1, %s2072_s11  }
   0xe   : > { %p2193_p11 = por %p242_p7, %p86_p0  ;;  %p2197_p12 = por %p248_p8, %p92_p3 }
   0xf   : > { %s1831_s24 = sshll.u32 %s2076_s12, 5  ;;  %s1791_s25 = sshll.u32 %s299_s23, 1 }
  0x10   : > { %s2816_s21 = scalar_select %p2193_p11, 1, 0 }
  0x11   : > { %s2817_s22 = scalar_select %p2197_p12, 1, 0 }
  0x12   : > { %s2206_s28 = scalar_lea.hbm %s2801_s2, %s1831_s24  ;;  %s303_s29 = scalar_lea.vmem [#allocation3], %s1791_s25 }
  0x13   : > { %s310_s14 = sshll.u32 %s303_s29, 4  ;;  %p2210_p13 = pnand %p1919_p10, %p2182_p5  ;;  %s2214_s14 = int_to_ptr.vmem [resolvable:$true] %s310_s14 }
  0x14   : > { %s2216_s17 = scalar_lea.sflag [#allocation4], %s299_s23  ;;  %s1980_s26 = scalar_lea.hbm %s2206_s28, 32 }
  0x15   : > { %p1981_p0 = scmp.ne.s32.totalorder %s2206_s28, %s1980_s26  ;;  %p1982_p1 = pneg %p2210_p13 }
  0x16   : > { %s1985_s25 = scalar_lea.hbm %s2801_s2, 64  ;;  %p1986_p4 = scmp.lt.u32.totalorder %s2206_s28, %s2801_s2 }
  0x17   : > { %p1983_p2 = pnand %p1982_p1, %p1981_p0  ;;  %p1987_p5 = scmp.lt.u32.totalorder %s1985_s25, %s1980_s26 }
  0x18   : > { %p1989_p8 = scmp.lt.u32.totalorder %s1980_s26, %s2206_s28 }
  0x19   : > { %p1984_p3 = pneg %p1983_p2  ;;  %p1988_p7 = por %p1987_p5, %p1986_p4 }
  0x1b   : > { %p1990_p10 = por %p1989_p8, %p1988_p7 }
  0x1d   : > { %p1991_p9 = pnand %p1990_p10, %p1984_p3 }
  0x1f   : > { %1994 = shalt.err (!%p1991_p9)
}
  0x20   : > { %s1995_s23 = scalar_lea.vmem %s2214_s14, 32  ;;  %s2078_s24 = smov [#allocation3]  }
  0x21   : > { %p1996_p0 = scmp.ne.s32.totalorder %s2214_s14, %s1995_s23  ;;  %s2000_s19 = sshll.u32 %s2078_s24, 4  ;;  %s2001_s19 = int_to_ptr.vmem [resolvable:$false] %s2000_s19 }
  0x22   : > { %s2002_s27 = scalar_lea.vmem %s2001_s19, 64  ;;  %p2003_p11 = scmp.lt.s32.totalorder %s2214_s14, %s2001_s19 }
  0x23   : > { %p1998_p2 = pnand %p1996_p0, %p1982_p1  ;;  %p2004_p4 = scmp.lt.s32.totalorder %s2002_s27, %s1995_s23 }
  0x25   : > { %p1999_p12 = pneg %p1998_p2  ;;  %p2005_p5 = por %p2004_p4, %p2003_p11 }
  0x27   : > { %p2006_p7 = pnand %p2005_p5, %p1999_p12 }
  0x29   : > { %2009 = shalt.err (!%p2006_p7)
}
  0x2a   : > { %s2079_s26 = smov 16   ;;  %s2080_s25 = smov 1  }
  0x2b   : > { %1914 = dma.hbm_to_vmem [thread:$0]  (!%p2210_p13), %s2206_s28, 32, %s2214_s14, %s2216_s17, %s2079_s26, %s2079_s26, %s2080_s25  }
  0x2c   : > { %p1794_p9 = scmp.ge.s32.totalorder %s2076_s12, 1  ;;  %p318_p1 = scmp.lt.s32.totalorder %s2076_s12, 3 }
  0x2e   : > { %p319_p3 = pnand %p1794_p9, %p318_p1 }
  0x2f   : > { %s2247_s29 = sand.u32 (!%p319_p3), 1, %s2068_s10  }
  0x30   : > { %322 = sbr.rel (%p319_p3) target bundleno = 1584 (0x630), region = 56  ;;  %s1795_s23 = sshll.u32 (!%p319_p3), %s2247_s29, 1 }
  0x31   : > { %s325_s24 = scalar_lea.sflag (!%p319_p3), [#allocation4], %s2247_s29  ;;  %s328_s19 = scalar_lea.vmem (!%p319_p3), [#allocation3], %s1795_s23 }
  0x37   : > { %2055 = dma.done.wait (%p2186_p6), %s325_s24, 32  }
  0x38   : > { %2057 = vsyncadd (%p2186_p6), %s325_s24, 4294967264  ;;  %s1797_s28 = sshll.u32 %s2164_s13, 1  ;;  %v383_v2 = vld [vmem:[%s2802_s3] sm:$0xff]  ;;  %vm402_vm0 = vcmask 130048   ;;  %v384_v10 = vld [vmem:[%s2802_s3 + $0x8] sm:$0xff]  ;;  %v2081_v18 = vmov 0  }
  0x39   : > { %p370_p11 = scmp.lt.s32.totalorder %s1797_s28, 3  ;;  %v2266_v4 = vld [vmem:[%s328_s19] ss:$0 sm:$0xff]  ;;  %v2268_v5 = vld [vmem:[%s328_s19 + $0x1] ss:$0 sm:$0xff]  ;;  %1967 = vset.pattern.permute.xlu1 %v2081_v18  ;;  %1966 = vset.pattern.permute.xlu0 %v2081_v18  ;;  %v388_v31 = vld [vmem:[%s2803_s4 + $0x8] sm:$0xff]  ;;  %v530_v18 = vlaneseq }
  0x3a   : > { %v398_v7 = vmul.f32 %v2266_v4, %v383_v2  ;;  %v427_v8 = vmul.f32 %v2268_v5, %v383_v2  ;;  %v399_v13 = vmul.f32 %v2266_v4, %v384_v10  ;;  %v428_v15 = vmul.f32 %v2268_v5, %v384_v10  ;;  %v387_v27 = vld [vmem:[%s2803_s4] sm:$0xff]  ;;  %s2082_s16 = smov 16   ;;  %s2083_s17 = smov 17  }
  0x3b   : > { %s2829_s28 = smov (!%p370_p11, %s1797_s28), 3  ;;  %s2084_s26 = smov 15   ;;  %vm922_vm13 = vcmask 588800  }
  0x3c   : > { %s1832_s14 = sshll.u32 %s2829_s28, 4  ;;  %v403_v12 = vsel %vm402_vm0, %v398_v7, 0.0  ;;  %v431_v14 = vsel %vm402_vm0, %v427_v8, 0.0  ;;  %v406_v16 = vsel %vm402_vm0, %v399_v13, 0.0  ;;  %v434_v17 = vsel %vm402_vm0, %v428_v15, 0.0  ;;  %s2085_s25 = smov 1  }
  0x3d   : > { %s2259_s27 = scalar_lea.vmem %s2800_s1, %s1832_s14  ;;  %404 = vadd.xlane.f32.xlu1 %v403_v12  ;;  %s2086_s20 = smov 127   ;;  %v2090_v15 = vmov 0.0  }
  0x3e   : > { %v378_v0 = vld [vmem:[%s2259_s27] sm:$0xff]  ;;  %v379_v1 = vld [vmem:[%s2259_s27 + $0x8] sm:$0xff]  ;;  %v1800_v6 = vld [vmem:[%s2259_s27 + $0x10] sm:$0xff]  ;;  %s2087_s23 = smov 113   ;;  %s2810_s24 = smov 112   ;;  %1061 = vmatprep.mubr.f32.mxu1 %v2090_v15  ;;  %990 = vmatprep.mubr.f32.mxu0 %v2090_v15 }
  0x3f   : > { %v447_v3 = vadd.f32 %v379_v1, %v378_v0  ;;  %v1801_v9 = vld [vmem:[%s2259_s27 + $0x18] sm:$0xff]  ;;  %s2812_s19 = smov 111   ;;  %p2821_p12 = scmp.ne.s32.totalorder %s2816_s21, 0 }
  0x40   : > { %v485_v11 = vadd.f32 %v1801_v9, %v1800_v6 }
  0x41   : > { %448 = vadd.xlane.f32.xlu0 %v447_v3  ;;  %432 = vadd.xlane.f32.xlu1 %v431_v14 }
  0x45   : > { %486 = vadd.xlane.f32.xlu0 %v485_v11  ;;  %435 = vadd.xlane.f32.xlu1 %v434_v17 }
  0x49   : > { %407 = vadd.xlane.f32.xlu0 %v406_v16  ;;  %v916_v16 = vld [vmem:[%s2805_s6] sm:$0xff] }
  0xca   : > { %v405_v21 = vpop.xlane.xlu1 %404 }
  0xcb   : > { %v415_v35 = vadd.f32 %v405_v21, %v387_v27  ;;  %v540_v21 = vshrl.u32 %v530_v18, 7 }
  0xcd   : > { %v460_v36 = vadd.f32 1.0, %v415_v35 }
  0xce   : > { %v449_v19 = vpop.xlane.xlu0 %448  ;;  %v433_v28 = vpop.xlane.xlu1 %432 }
  0xcf   : > { %v451_v20 = vmul.f32 0.00390625, %v449_v19  ;;  %v443_v29 = vadd.f32 %v433_v28, %v387_v27  ;;  %v537_v27 = vld [vmem:[%s2799_s0] sm:$0xf]  ;;  %v1805_v28 = vld [vmem:[%s2799_s0 + $0x4] sm:$0xf] }
  0xd1   : > { %v452_v22 = vsub.f32 %v378_v0, %v451_v20  ;;  %v453_v23 = vsub.f32 %v379_v1, %v451_v20  ;;  %v497_v33 = vadd.f32 1.0, %v443_v29  ;;  %v2379_v29 = vsub.s32 2, %v540_v21 }
  0xd2   : > { %v487_v24 = vpop.xlane.xlu0 %486  ;;  %v436_v43 = vpop.xlane.xlu1 %435 }
  0xd3   : > { %v454_v25 = vmul.f32 %v452_v22, %v452_v22  ;;  %v455_v26 = vmul.f32 %v453_v23, %v453_v23  ;;  %504 = vperm.xlu1 %1967, %v497_v33   ;;  %v488_v37 = vmul.f32 0.00390625, %v487_v24  ;;  %v444_v44 = vadd.f32 %v436_v43, %v388_v31 }
  0xd5   : > { %v456_v30 = vadd.f32 %v455_v26, %v454_v25  ;;  %v489_v38 = vsub.f32 %v1800_v6, %v488_v37  ;;  %v490_v39 = vsub.f32 %v1801_v9, %v488_v37  ;;  %v2368_v25 = vsub.s32 1, %v540_v21 }
  0xd6   : > { %v408_v32 = vpop.xlane.xlu0 %407  ;;  %v2370_v26 = vsub.s32 0, %v540_v21 }
  0xd7   : > { %457 = vadd.xlane.f32.xlu0 %v456_v30  ;;  %v416_v34 = vadd.f32 %v408_v32, %v388_v31  ;;  %v491_v40 = vmul.f32 %v489_v38, %v489_v38  ;;  %v492_v41 = vmul.f32 %v490_v39, %v490_v39  ;;  %v2381_v30 = vsub.s32 3, %v540_v21 }
  0xd8   : > { %v546_v33 = vrot.slane %v537_v27, %v2368_v25  ;;  %v586_v35 = vrot.slane %v1805_v28, %v2370_v26 }
  0xd9   : > { %474 = vperm.xlu1 %1967, %v416_v34   ;;  %v493_v42 = vadd.f32 %v492_v41, %v491_v40  ;;  %v542_v34 = vrot.slane %v537_v27, %v2370_v26 }
  0xed   : > { %467 = vperm.xlu0 %1966, %v460_v36   ;;  %v590_v36 = vrot.slane %v1805_v28, %v2368_v25 }
  0xfd   : > { %494 = vadd.xlane.f32.xlu1 %v493_v42  ;;  %v554_v42 = vrot.slane %v537_v27, %v2381_v30 }
 0x10e   : > { %511 = vperm.xlu1 %1967, %v444_v44  }
 0x152   : > { %v505_v48 = vpop.permute.xlu1 %504 }
 0x158   : > { %v475_v55 = vpop.permute.xlu1 %474 }
 0x164   : > { %v458_v45 = vpop.xlane.xlu0 %457 }
 0x165   : > { %v459_v46 = vmul.f32 0.00390625, %v458_v45  ;;  %v594_v45 = vrot.slane %v1805_v28, %v2379_v29 }
 0x167   : > { %v461_v47 = vadd.f32 1e-05, %v459_v46  ;;  %v598_v46 = vrot.slane %v1805_v28, %v2381_v30 }
 0x169   : > { %1968 = vrsqrt.f32 %v461_v47 }
 0x16c   : > { %v468_v52 = vpop.permute.xlu0 %467 }
 0x173   : > { %v1969_v49 = vpop.eup %1968 }
 0x174   : > { %v463_v50 = vmul.f32 %v1969_v49, %v452_v22  ;;  %v464_v51 = vmul.f32 %v1969_v49, %v453_v23  ;;  %v2366_v22 = vand.u32 127, %v530_v18 }
 0x176   : > { %v470_v53 = vmul.f32 %v468_v52, %v463_v50  ;;  %v471_v54 = vmul.f32 %v468_v52, %v464_v51  ;;  %vm532_vm5 = vcmp.lt.s32.totalorder %v2366_v22, 17  ;;  %vm575_vm6 = vcmp.lt.s32.totalorder %v2366_v22, 16 }
 0x177   : > { %vm619_vm7 = vcmp.lt.s32.totalorder %v2366_v22, 15  ;;  %vm663_vm8 = vcmp.lt.s32.totalorder %v2366_v22, 1  ;;  %vm711_vm9 = vcmp.lt.s32.totalorder %v2366_v22, 127  ;;  %vm755_vm10 = vcmp.lt.s32.totalorder %v2366_v22, 113 }
 0x178   : > { %v477_v56 = vadd.f32 %v475_v55, %v470_v53  ;;  %v478_v57 = vadd.f32 %v475_v55, %v471_v54  ;;  %vm799_vm11 = vcmp.lt.s32.totalorder %v2366_v22, 112  ;;  %vm843_vm12 = vcmp.lt.s32.totalorder %v2366_v22, 111  ;;  %v1486_v22 = vld [vmem:[%s2806_s7] sm:$0xff] }
 0x17a   : > { %vm479_vm1 = vcmp.ge.f32.partialorder %v477_v56, 0.0  ;;  %vm480_vm2 = vcmp.ge.f32.partialorder %v478_v57, 0.0  ;;  %v481_v58 = vmul.f32 0.2, %v477_v56  ;;  %v482_v59 = vmul.f32 0.2, %v478_v57 }
 0x17c   : > { %v2289_v60 = vsel %vm479_vm1, %v477_v56, %v481_v58  ;;  %v2291_v61 = vsel %vm480_vm2, %v478_v57, %v482_v59  ;;  %vm1533_vm2 = vcmask 654336  }
 0x17d   : > { %569 = vrot.lane.b32.xlu0 %v2291_v61, %s2082_s16  ;;  %522 = vrot.lane.b32.xlu1 %v2289_v60, %s2083_s17 }
 0x181   : > { %524 = vrot.lane.b32.xlu1 %v2291_v61, %s2083_s17 }
 0x18a   : > { %v495_v62 = vpop.xlane.xlu1 %494 }
 0x18b   : > { %v496_v63 = vmul.f32 0.00390625, %v495_v62 }
 0x18d   : > { %v498_v0 = vadd.f32 1e-05, %v496_v63 }
 0x18e   : > { %v512_v8 = vpop.permute.xlu1 %511 }
 0x18f   : > { %1970 = vrsqrt.f32 %v498_v0 }
 0x199   : > { %v1971_v1 = vpop.eup %1970 }
 0x19a   : > { %v500_v2 = vmul.f32 %v1971_v1, %v489_v38  ;;  %v501_v3 = vmul.f32 %v1971_v1, %v490_v39  ;;  %v550_v39 = vrot.slane %v537_v27, %v2379_v29 }
 0x19c   : > { %v507_v6 = vmul.f32 %v505_v48, %v500_v2  ;;  %v508_v7 = vmul.f32 %v505_v48, %v501_v3 }
 0x19e   : > { %v514_v9 = vadd.f32 %v512_v8, %v507_v6  ;;  %v515_v10 = vadd.f32 %v512_v8, %v508_v7  ;;  %v1806_v7 = vld [vmem:[%s2799_s0 + $0x8] sm:$0xf]  ;;  %v1807_v8 = vld [vmem:[%s2799_s0 + $0xc] sm:$0xf] }
 0x19f   : > { %v642_v21 = vrot.slane %v1806_v7, %v2381_v30 }
 0x1a0   : > { %vm516_vm3 = vcmp.ge.f32.partialorder %v514_v9, 0.0  ;;  %vm517_vm4 = vcmp.ge.f32.partialorder %v515_v10, 0.0  ;;  %v518_v11 = vmul.f32 0.2, %v514_v9  ;;  %v519_v12 = vmul.f32 0.2, %v515_v10 }
 0x1a2   : > { %v2299_v13 = vsel %vm516_vm3, %v514_v9, %v518_v11  ;;  %v2301_v14 = vsel %vm517_vm4, %v515_v10, %v519_v12  ;;  %v630_v11 = vrot.slane %v1806_v7, %v2370_v26  ;;  %v634_v12 = vrot.slane %v1806_v7, %v2368_v25 }
 0x1a3   : > { %573 = vrot.lane.b32.xlu0 %v2301_v14, %s2082_s16  ;;  %526 = vrot.lane.b32.xlu1 %v2299_v13, %s2083_s17 }
 0x1a7   : > { %613 = vrot.lane.b32.xlu0 %v2291_v61, %s2084_s26  ;;  %528 = vrot.lane.b32.xlu1 %v2301_v14, %s2083_s17 }
 0x1ab   : > { %617 = vrot.lane.b32.xlu0 %v2301_v14, %s2084_s26  ;;  %567 = vrot.lane.b32.xlu1 %v2289_v60, %s2082_s16 }
 0x1af   : > { %657 = vrot.lane.b32.xlu0 %v2291_v61, %s2085_s25  ;;  %571 = vrot.lane.b32.xlu1 %v2299_v13, %s2082_s16 }
 0x1b3   : > { %661 = vrot.lane.b32.xlu0 %v2301_v14, %s2085_s25  ;;  %611 = vrot.lane.b32.xlu1 %v2289_v60, %s2084_s26 }
 0x1b7   : > { %705 = vrot.lane.b32.xlu0 %v2291_v61, %s2086_s20  ;;  %615 = vrot.lane.b32.xlu1 %v2299_v13, %s2084_s26 }
 0x1bb   : > { %709 = vrot.lane.b32.xlu0 %v2301_v14, %s2086_s20  ;;  %655 = vrot.lane.b32.xlu1 %v2289_v60, %s2085_s25 }
 0x1bf   : > { %749 = vrot.lane.b32.xlu0 %v2291_v61, %s2087_s23  ;;  %659 = vrot.lane.b32.xlu1 %v2299_v13, %s2085_s25 }
 0x1c3   : > { %753 = vrot.lane.b32.xlu0 %v2301_v14, %s2087_s23  ;;  %703 = vrot.lane.b32.xlu1 %v2289_v60, %s2086_s20 }
 0x1c7   : > { %793 = vrot.lane.b32.xlu0 %v2291_v61, %s2810_s24  ;;  %707 = vrot.lane.b32.xlu1 %v2299_v13, %s2086_s20 }
 0x1cb   : > { %797 = vrot.lane.b32.xlu0 %v2301_v14, %s2810_s24  ;;  %747 = vrot.lane.b32.xlu1 %v2289_v60, %s2087_s23 }
 0x1cf   : > { %837 = vrot.lane.b32.xlu0 %v2291_v61, %s2812_s19  ;;  %751 = vrot.lane.b32.xlu1 %v2299_v13, %s2087_s23 }
 0x1d3   : > { %841 = vrot.lane.b32.xlu0 %v2301_v14, %s2812_s19  ;;  %791 = vrot.lane.b32.xlu1 %v2289_v60, %s2810_s24 }
 0x1d7   : > { %795 = vrot.lane.b32.xlu1 %v2299_v13, %s2810_s24 }
 0x1db   : > { %835 = vrot.lane.b32.xlu1 %v2289_v60, %s2812_s19 }
 0x1df   : > { %839 = vrot.lane.b32.xlu1 %v2299_v13, %s2812_s19 }
 0x1e3   : > { %919 = vperm.xlu1 %1967, %v916_v16   ;;  %v674_v16 = vrot.slane %v1807_v8, %v2370_v26 }
 0x1ef   : > { %v523_v17 = vpop.permute.xlu1 %522  ;;  %v570_v19 = vpop.permute.xlu0 %569 }
 0x1f3   : > { %v525_v20 = vpop.permute.xlu1 %524 }
 0x1f4   : > { %v535_v37 = vsel %vm532_vm5, %v523_v17, %v525_v20 }
 0x1f5   : > { %v560_v49 = vmul.f32 %v546_v33, %v535_v37  ;;  %v686_v33 = vrot.slane %v1807_v8, %v2381_v30 }
 0x215   : > { %v574_v23 = vpop.permute.xlu0 %573  ;;  %v527_v24 = vpop.permute.xlu1 %526 }
 0x216   : > { %v534_v51 = vsel %vm532_vm5, %v525_v20, %v527_v24  ;;  %v638_v20 = vrot.slane %v1806_v7, %v2379_v29 }
 0x217   : > { %v561_v59 = vmul.f32 %v550_v39, %v534_v51 }
 0x219   : > { %v2383_v31 = vpop.permute.xlu0 %613  ;;  %v529_v32 = vpop.permute.xlu1 %528 }
 0x21a   : > { %v536_v38 = vsel %vm532_vm5, %v529_v32, %v523_v17  ;;  %v533_v52 = vsel %vm532_vm5, %v527_v24, %v529_v32  ;;  %v678_v17 = vrot.slane %v1807_v8, %v2368_v25  ;;  %v682_v32 = vrot.slane %v1807_v8, %v2379_v29 }
 0x21b   : > { %v559_v47 = vmul.f32 %v542_v34, %v536_v38  ;;  %v562_v63 = vmul.f32 %v554_v42, %v533_v52  ;;  %v1808_v38 = vld [vmem:[%s2799_s0 + $0x14] sm:$0xf] }
 0x21d   : > { %v618_v40 = vpop.permute.xlu0 %617  ;;  %v568_v41 = vpop.permute.xlu1 %567 }
 0x21e   : > { %v578_v43 = vsel %vm575_vm6, %v568_v41, %v570_v19  ;;  %v579_v44 = vsel %vm575_vm6, %v574_v23, %v568_v41 }
 0x21f   : > { %v603_v48 = vmul.f32 %v586_v35, %v579_v44  ;;  %v604_v50 = vmul.f32 %v590_v36, %v578_v43 }
 0x221   : > { %v658_v53 = vpop.permute.xlu0 %657  ;;  %v572_v54 = vpop.permute.xlu1 %571  ;;  %v1835_v55 = vpack.c.bf16 %v604_v50, %v560_v49  ;;  %v1837_v56 = vpack.c.bf16 %v603_v48, %v559_v47  ;;  %v734_v48 = vrot.slane %v1808_v38, %v2381_v30 }
 0x222   : > { %v576_v57 = vsel %vm575_vm6, %v572_v54, %v574_v23  ;;  %v577_v58 = vsel %vm575_vm6, %v570_v19, %v572_v54 }
 0x223   : > { %v605_v62 = vmul.f32 %v594_v45, %v577_v58  ;;  %1836 = vmatprep.subr.bf16.mxu0 %v1835_v55  ;;  %v606_v0 = vmul.f32 %v598_v46, %v576_v57 }
 0x224   : > { %1838 = vmatpush1.bf16.msra.mxu0 %v1837_v56  ;;  %v722_v56 = vrot.slane %v1808_v38, %v2370_v26 }
 0x225   : > { %v662_v1 = vpop.permute.xlu0 %661  ;;  %v612_v2 = vpop.permute.xlu1 %611  ;;  %v1851_v3 = vpack.c.bf16 %v606_v0, %v562_v63  ;;  %v1853_v6 = vpack.c.bf16 %v605_v62, %v561_v59  ;;  %v726_v59 = vrot.slane %v1808_v38, %v2368_v25  ;;  %v730_v62 = vrot.slane %v1808_v38, %v2379_v29 }
 0x226   : > { %v622_v18 = vsel %vm619_vm7, %v612_v2, %v2383_v31  ;;  %v623_v19 = vsel %vm619_vm7, %v618_v40, %v612_v2 }
 0x227   : > { %1852 = vmatprep.subr.bf16.mxu1 %v1851_v3  ;;  %v647_v34 = vmul.f32 %v630_v11, %v623_v19  ;;  %v648_v35 = vmul.f32 %v634_v12, %v622_v18 }
 0x228   : > { %1854 = vmatpush1.bf16.msra.mxu1 %v1853_v6 }
 0x229   : > { %v706_v9 = vpop.permute.xlu0 %705  ;;  %v616_v10 = vpop.permute.xlu1 %615 }
 0x22a   : > { %v620_v39 = vsel %vm619_vm7, %v616_v10, %v618_v40  ;;  %v621_v41 = vsel %vm619_vm7, %v2383_v31, %v616_v10 }
 0x22b   : > { %v649_v40 = vmul.f32 %v638_v20, %v621_v41  ;;  %v650_v49 = vmul.f32 %v642_v21, %v620_v39 }
 0x22d   : > { %v710_v23 = vpop.permute.xlu0 %709  ;;  %v656_v24 = vpop.permute.xlu1 %655 }
 0x22e   : > { %v666_v27 = vsel %vm663_vm8, %v656_v24, %v658_v53  ;;  %v667_v28 = vsel %vm663_vm8, %v662_v1, %v656_v24 }
 0x22f   : > { %v691_v36 = vmul.f32 %v674_v16, %v667_v28  ;;  %v692_v37 = vmul.f32 %v678_v17, %v666_v27 }
 0x231   : > { %v2443_v42 = vpop.permute.xlu0 %749  ;;  %v660_v43 = vpop.permute.xlu1 %659  ;;  %v1839_v44 = vpack.c.bf16 %v692_v37, %v648_v35  ;;  %v1841_v45 = vpack.c.bf16 %v691_v36, %v647_v34  ;;  %v1811_v36 = vld [vmem:[%s2799_s0 + $0x20] sm:$0xf] }
 0x232   : > { %v664_v46 = vsel %vm663_vm8, %v660_v43, %v662_v1  ;;  %v665_v47 = vsel %vm663_vm8, %v658_v53, %v660_v43 }
 0x233   : > { %v693_v50 = vmul.f32 %v682_v32, %v665_v47  ;;  %v694_v51 = vmul.f32 %v686_v33, %v664_v46  ;;  %1840 = vmatprep.subr.bf16.mxu0 %v1839_v44 }
 0x234   : > { %1842 = vmatpush1.bf16.msra.mxu0 %v1841_v45 }
 0x235   : > { %v754_v31 = vpop.permute.xlu0 %753  ;;  %v704_v52 = vpop.permute.xlu1 %703  ;;  %v1855_v54 = vpack.c.bf16 %v694_v51, %v650_v49  ;;  %v1857_v55 = vpack.c.bf16 %v693_v50, %v649_v40 }
 0x236   : > { %v715_v57 = vsel %vm711_vm9, %v710_v23, %v704_v52  ;;  %v714_v53 = vsel %vm711_vm9, %v704_v52, %v706_v9 }
 0x237   : > { %v742_v58 = vmul.f32 %v734_v48, %v715_v57  ;;  %1856 = vmatprep.subr.bf16.mxu1 %v1855_v54  ;;  %v739_v1 = vmul.f32 %v722_v56, %v714_v53  ;;  %v866_v48 = vrot.slane %v1811_v36, %v2381_v30 }
 0x238   : > { %1858 = vmatpush1.bf16.msra.mxu1 %v1857_v55 }
 0x239   : > { %v708_v63 = vpop.permute.xlu1 %707  ;;  %v1859_v0 = vpack.c.bf16 %v742_v58, %v2301_v14  ;;  %v794_v6 = vpop.permute.xlu0 %793  ;;  %v1845_v16 = vpack.c.bf16 %v739_v1, %v2289_v60  ;;  %v1809_v14 = vld [vmem:[%s2799_s0 + $0x18] sm:$0xf]  ;;  %v858_v58 = vrot.slane %v1811_v36, %v2368_v25 }
 0x23a   : > { %v712_v2 = vsel %vm711_vm9, %v708_v63, %v710_v23  ;;  %v713_v3 = vsel %vm711_vm9, %v706_v9, %v708_v63  ;;  %v1810_v9 = vld [vmem:[%s2799_s0 + $0x1c] sm:$0xf]  ;;  %v770_v19 = vrot.slane %v1809_v14, %v2368_v25  ;;  %v774_v21 = vrot.slane %v1809_v14, %v2379_v29 }
 0x23b   : > { %v740_v7 = vmul.f32 %v726_v59, %v713_v3  ;;  %v741_v8 = vmul.f32 %v730_v62, %v712_v2  ;;  %1860 = vmatprep.subr.bf16.mxu1 %v1859_v0  ;;  %v822_v60 = vrot.slane %v1810_v9, %v2381_v30  ;;  %v810_v23 = vrot.slane %v1810_v9, %v2370_v26 }
 0x23c   : > { %v814_v27 = vrot.slane %v1810_v9, %v2368_v25  ;;  %v818_v35 = vrot.slane %v1810_v9, %v2379_v29  ;;  %v766_v37 = vrot.slane %v1809_v14, %v2370_v26  ;;  %v862_v59 = vrot.slane %v1811_v36, %v2379_v29 }
 0x23d   : > { %v748_v10 = vpop.permute.xlu1 %747  ;;  %v1843_v11 = vpack.c.bf16 %v740_v7, %v2291_v61  ;;  %v1861_v12 = vpack.c.bf16 %v741_v8, %v2299_v13  ;;  %v798_v17 = vpop.permute.xlu0 %797  ;;  %v778_v61 = vrot.slane %v1809_v14, %v2381_v30  ;;  %v854_v62 = vrot.slane %v1811_v36, %v2370_v26  ;;  %v879_v7 = vld [vmem:[%s2804_s5] sm:$0xff] }
 0x23e   : > { %v759_v13 = vsel %vm755_vm10, %v754_v31, %v748_v10  ;;  %v758_v41 = vsel %vm755_vm10, %v748_v10, %v2443_v42 }
 0x23f   : > { %1844 = vmatprep.subr.bf16.mxu0 %v1843_v11  ;;  %1862 = vmatpush1.bf16.msra.mxu1 %v1861_v12  ;;  %v786_v28 = vmul.f32 %v778_v61, %v759_v13  ;;  %v386_v12 = vld [vmem:[%s2802_s3 + $0x18] sm:$0xff] }
 0x240   : > { %1846 = vmatpush1.bf16.msra.mxu0 %v1845_v16 }
 0x241   : > { %v752_v18 = vpop.permute.xlu1 %751  ;;  %v838_v32 = vpop.permute.xlu0 %837 }
 0x242   : > { %v756_v38 = vsel %vm755_vm10, %v752_v18, %v754_v31  ;;  %v757_v39 = vsel %vm755_vm10, %v2443_v42, %v752_v18  ;;  %v783_v31 = vmul.f32 %v766_v37, %v758_v41 }
 0x243   : > { %v784_v40 = vmul.f32 %v770_v19, %v757_v39  ;;  %v785_v49 = vmul.f32 %v774_v21, %v756_v38  ;;  %v401_v19 = vmul.f32 %v2266_v4, %v386_v12  ;;  %v389_v38 = vld [vmem:[%s2803_s4 + $0x10] sm:$0xff] }
 0x245   : > { %v792_v20 = vpop.permute.xlu1 %791  ;;  %v842_v42 = vpop.permute.xlu0 %841 }
 0x246   : > { %v803_v24 = vsel %vm799_vm11, %v798_v17, %v792_v20  ;;  %v802_v33 = vsel %vm799_vm11, %v792_v20, %v794_v6 }
 0x247   : > { %v830_v34 = vmul.f32 %v822_v60, %v803_v24  ;;  %v827_v45 = vmul.f32 %v810_v23, %v802_v33  ;;  %v412_v23 = vsel %vm402_vm0, %v401_v19, 0.0 }
 0x249   : > { %v796_v43 = vpop.permute.xlu1 %795  ;;  %v1863_v44 = vpack.c.bf16 %v830_v34, %v786_v28  ;;  %v1849_v57 = vpack.c.bf16 %v827_v45, %v783_v31 }
 0x24a   : > { %v800_v46 = vsel %vm799_vm11, %v796_v43, %v798_v17  ;;  %v801_v47 = vsel %vm799_vm11, %v794_v6, %v796_v43  ;;  %v385_v17 = vld [vmem:[%s2802_s3 + $0x10] sm:$0xff] }
 0x24b   : > { %v828_v50 = vmul.f32 %v814_v27, %v801_v47  ;;  %v829_v51 = vmul.f32 %v818_v35, %v800_v46  ;;  %1864 = vmatprep.subr.bf16.mxu1 %v1863_v44  ;;  %v400_v20 = vmul.f32 %v2266_v4, %v385_v17  ;;  %v429_v27 = vmul.f32 %v2268_v5, %v385_v17 }
 0x24d   : > { %v836_v52 = vpop.permute.xlu1 %835  ;;  %v1847_v54 = vpack.c.bf16 %v828_v50, %v784_v40  ;;  %v1865_v55 = vpack.c.bf16 %v829_v51, %v785_v49  ;;  %v409_v24 = vsel %vm402_vm0, %v400_v20, 0.0  ;;  %v437_v28 = vsel %vm402_vm0, %v429_v27, 0.0 }
 0x24e   : > { %v847_v56 = vsel %vm843_vm12, %v842_v42, %v836_v52  ;;  %v846_v63 = vsel %vm843_vm12, %v836_v52, %v838_v32  ;;  %v390_v52 = vld [vmem:[%s2803_s4 + $0x18] sm:$0xff] }
 0x24f   : > { %v874_v53 = vmul.f32 %v866_v48, %v847_v56  ;;  %1848 = vmatprep.subr.bf16.mxu0 %v1847_v54  ;;  %1866 = vmatpush1.bf16.msra.mxu1 %v1865_v55  ;;  %v871_v8 = vmul.f32 %v854_v62, %v846_v63 }
 0x250   : > { %1850 = vmatpush1.bf16.msra.mxu0 %v1849_v57 }
 0x251   : > { %1013 = vmatprep.subr.mxu1 %v874_v53  ;;  %v840_v0 = vpop.permute.xlu1 %839 }
 0x252   : > { %v844_v1 = vsel %vm843_vm12, %v840_v0, %v842_v42  ;;  %v845_v2 = vsel %vm843_vm12, %v838_v32, %v840_v0  ;;  %v430_v32 = vmul.f32 %v2268_v5, %v386_v12 }
 0x253   : > { %v872_v3 = vmul.f32 %v858_v58, %v845_v2  ;;  %v873_v6 = vmul.f32 %v862_v59, %v844_v1 }
 0x254   : > { %v440_v33 = vsel %vm402_vm0, %v430_v32, 0.0 }
 0x255   : > { %942 = vmatprep.subr.mxu0 %v872_v3  ;;  %1014 = vmatpush1.msra.mxu1 %v873_v6 }
 0x256   : > { %943 = vmatpush1.msra.mxu0 %v871_v8  ;;  %1813 = vmatmul.mubr.msk.f32.vlgmr.msra.gmra.mrb[0].mxu1 %vm922_vm13, %v879_v7 }
 0x257   : > { %1812 = vmatmul.mubr.msk.f32.vlgmr.msra.gmra.mrb[0].mxu0 %vm922_vm13, %v879_v7  ;;  %1672 = vmatprep.mubr.f32.mxu1 %v2090_v15 }
 0x258   : > { %1601 = vmatprep.mubr.f32.mxu0 %v2090_v15 }
 0x262   : > { %v920_v10 = vpop.permute.xlu1 %919 }
 0x329   : > { %v1063_v11 = vpop.f32.mrb[0].mxu1 }
 0x32a   : > { %v1064_v16 = vadd.f32 %v1063_v11, %v920_v10  ;;  %v992_v14 = vpop.f32.mrb[0].mxu0  ;;  %v1065_v9 = vpop.f32.mrb[1].mxu1 }
 0x32b   : > { %v993_v18 = vadd.f32 %v992_v14, %v920_v10  ;;  %v1066_v61 = vadd.f32 %v1065_v9, %v920_v10  ;;  %v994_v60 = vpop.f32.mrb[1].mxu0 }
 0x32c   : > { %v995_v13 = vadd.f32 %v994_v60, %v920_v10 }
 0x32d   : > { %v1105_v15 = vadd.f32 %v1066_v61, %v1064_v16 }
 0x32e   : > { %v1068_v21 = vadd.f32 %v995_v13, %v993_v18 }
 0x32f   : > { %1106 = vadd.xlane.f32.xlu1 %v1105_v15 }
 0x330   : > { %1069 = vadd.xlane.f32.xlu0 %v1068_v21 }
 0x333   : > { %413 = vadd.xlane.f32.xlu1 %v412_v23 }
 0x334   : > { %410 = vadd.xlane.f32.xlu0 %v409_v24 }
 0x338   : > { %438 = vadd.xlane.f32.xlu0 %v437_v28 }
 0x33c   : > { %441 = vadd.xlane.f32.xlu0 %v440_v33  ;;  %v1527_v33 = vld [vmem:[%s2807_s8] sm:$0xff] }
 0x3bc   : > { %v1107_v4 = vpop.xlane.xlu1 %1106 }
 0x3bd   : > { %v1108_v34 = vmul.f32 0.00390625, %v1107_v4  ;;  %v1070_v35 = vpop.xlane.xlu0 %1069 }
 0x3be   : > { %v1071_v40 = vmul.f32 0.00390625, %v1070_v35  ;;  %v1158_v35 = vld [vmem:[%s2799_s0] sm:$0xf] }
 0x3bf   : > { %v1109_v36 = vsub.f32 %v1064_v16, %v1108_v34  ;;  %v1110_v37 = vsub.f32 %v1066_v61, %v1108_v34 }
 0x3c0   : > { %v1072_v49 = vsub.f32 %v993_v18, %v1071_v40  ;;  %v1073_v50 = vsub.f32 %v995_v13, %v1071_v40  ;;  %v414_v54 = vpop.xlane.xlu1 %413 }
 0x3c1   : > { %v411_v39 = vpop.xlane.xlu0 %410  ;;  %v1111_v41 = vmul.f32 %v1109_v36, %v1109_v36  ;;  %v1112_v43 = vmul.f32 %v1110_v37, %v1110_v37  ;;  %v418_v55 = vadd.f32 %v414_v54, %v390_v52 }
 0x3c2   : > { %v417_v44 = vadd.f32 %v411_v39, %v389_v38  ;;  %v1074_v51 = vmul.f32 %v1072_v49, %v1072_v49  ;;  %v1075_v31 = vmul.f32 %v1073_v50, %v1073_v50  ;;  %v1167_v39 = vrot.slane %v1158_v35, %v2368_v25 }
 0x3c3   : > { %v1113_v45 = vadd.f32 %v1112_v43, %v1111_v41 }
 0x3c4   : > { %v1080_v46 = vadd.f32 1.0, %v417_v44  ;;  %v1076_v42 = vadd.f32 %v1075_v31, %v1074_v51  ;;  %v1163_v44 = vrot.slane %v1158_v35, %v2370_v26 }
 0x3c5   : > { %1114 = vadd.xlane.f32.xlu0 %v1113_v45  ;;  %v439_v5 = vpop.xlane.xlu0 %438  ;;  %v1171_v45 = vrot.slane %v1158_v35, %v2379_v29 }
 0x3c6   : > { %1087 = vperm.xlu1 %1967, %v1080_v46   ;;  %v445_v47 = vadd.f32 %v439_v5, %v389_v38  ;;  %v1175_v46 = vrot.slane %v1158_v35, %v2381_v30 }
 0x3c8   : > { %v1117_v48 = vadd.f32 1.0, %v445_v47 }
 0x3c9   : > { %v442_v56 = vpop.xlane.xlu0 %441 }
 0x3ca   : > { %v446_v57 = vadd.f32 %v442_v56, %v390_v52 }
 0x3db   : > { %1124 = vperm.xlu0 %1966, %v1117_v48  }
 0x3ea   : > { %1077 = vadd.xlane.f32.xlu1 %v1076_v42 }
 0x3fb   : > { %1094 = vperm.xlu1 %1967, %v418_v55  }
 0x3ff   : > { %1131 = vperm.xlu1 %1967, %v446_v57  }
 0x445   : > { %v1088_v59 = vpop.permute.xlu1 %1087 }
 0x452   : > { %v1115_v53 = vpop.xlane.xlu0 %1114 }
 0x453   : > { %v1116_v58 = vmul.f32 0.00390625, %v1115_v53 }
 0x455   : > { %v1118_v62 = vadd.f32 1e-05, %v1116_v58 }
 0x457   : > { %1972 = vrsqrt.f32 %v1118_v62 }
 0x45a   : > { %v1125_v12 = vpop.permute.xlu0 %1124 }
 0x461   : > { %v1973_v2 = vpop.eup %1972 }
 0x462   : > { %v1120_v6 = vmul.f32 %v1973_v2, %v1109_v36  ;;  %v1121_v7 = vmul.f32 %v1973_v2, %v1110_v37  ;;  %v1814_v36 = vld [vmem:[%s2799_s0 + $0x4] sm:$0xf] }
 0x463   : > { %v1209_v41 = vrot.slane %v1814_v36, %v2368_v25  ;;  %v1217_v52 = vrot.slane %v1814_v36, %v2381_v30 }
 0x464   : > { %v1127_v14 = vmul.f32 %v1125_v12, %v1120_v6  ;;  %v1128_v9 = vmul.f32 %v1125_v12, %v1121_v7  ;;  %v1815_v12 = vld [vmem:[%s2799_s0 + $0x8] sm:$0xf] }
 0x477   : > { %v1078_v63 = vpop.xlane.xlu1 %1077 }
 0x478   : > { %v1079_v0 = vmul.f32 0.00390625, %v1078_v63 }
 0x47a   : > { %v1081_v1 = vadd.f32 1e-05, %v1079_v0 }
 0x47b   : > { %v1095_v3 = vpop.permute.xlu1 %1094 }
 0x47c   : > { %1974 = vrsqrt.f32 %v1081_v1 }
 0x47f   : > { %v1132_v16 = vpop.permute.xlu1 %1131 }
 0x480   : > { %v1134_v13 = vadd.f32 %v1132_v16, %v1127_v14  ;;  %v1135_v19 = vadd.f32 %v1132_v16, %v1128_v9  ;;  %v1816_v16 = vld [vmem:[%s2799_s0 + $0xc] sm:$0xf] }
 0x482   : > { %v1138_v24 = vmul.f32 0.2, %v1134_v13  ;;  %v1139_v27 = vmul.f32 0.2, %v1135_v19  ;;  %vm1136_vm0 = vcmp.ge.f32.partialorder %v1134_v13, 0.0  ;;  %vm1137_vm1 = vcmp.ge.f32.partialorder %v1135_v19, 0.0 }
 0x484   : > { %v2549_v28 = vsel %vm1136_vm0, %v1134_v13, %v1138_v24  ;;  %v2551_v32 = vsel %vm1137_vm1, %v1135_v19, %v1139_v27  ;;  %v1255_v13 = vrot.slane %v1815_v12, %v2379_v29  ;;  %v1259_v19 = vrot.slane %v1815_v12, %v2381_v30 }
 0x486   : > { %v1975_v8 = vpop.eup %1974 }
 0x487   : > { %v1083_v10 = vmul.f32 %v1975_v8, %v1072_v49  ;;  %v1084_v11 = vmul.f32 %v1975_v8, %v1073_v50  ;;  %v1205_v49 = vrot.slane %v1814_v36, %v2370_v26  ;;  %v1213_v50 = vrot.slane %v1814_v36, %v2379_v29 }
 0x489   : > { %v1090_v17 = vmul.f32 %v1088_v59, %v1083_v10  ;;  %v1091_v18 = vmul.f32 %v1088_v59, %v1084_v11 }
 0x48b   : > { %v1097_v61 = vadd.f32 %v1095_v3, %v1090_v17  ;;  %v1098_v60 = vadd.f32 %v1095_v3, %v1091_v18  ;;  %v1251_v17 = vrot.slane %v1815_v12, %v2368_v25  ;;  %v1293_v18 = vrot.slane %v1816_v16, %v2368_v25 }
 0x48d   : > { %vm1099_vm14 = vcmp.ge.f32.partialorder %v1097_v61, 0.0  ;;  %vm1100_vm15 = vcmp.ge.f32.partialorder %v1098_v60, 0.0  ;;  %v1101_v15 = vmul.f32 0.2, %v1097_v61  ;;  %v1102_v20 = vmul.f32 0.2, %v1098_v60 }
 0x48f   : > { %v2541_v21 = vsel %vm1099_vm14, %v1097_v61, %v1101_v15  ;;  %v2543_v23 = vsel %vm1100_vm15, %v1098_v60, %v1102_v20  ;;  %v1247_v60 = vrot.slane %v1815_v12, %v2370_v26 }
 0x490   : > { %1146 = vrot.lane.b32.xlu0 %v2541_v21, %s2083_s17  ;;  %1148 = vrot.lane.b32.xlu1 %v2543_v23, %s2083_s17 }
 0x494   : > { %1152 = vrot.lane.b32.xlu1 %v2551_v32, %s2083_s17  ;;  %1150 = vrot.lane.b32.xlu0 %v2549_v28, %s2083_s17  ;;  %s2819_s17 = smov 112  }
 0x498   : > { %1190 = vrot.lane.b32.xlu1 %v2543_v23, %s2082_s16  ;;  %1188 = vrot.lane.b32.xlu0 %v2541_v21, %s2082_s16 }
 0x49c   : > { %1194 = vrot.lane.b32.xlu1 %v2551_v32, %s2082_s16  ;;  %1192 = vrot.lane.b32.xlu0 %v2549_v28, %s2082_s16 }
 0x4a0   : > { %1232 = vrot.lane.b32.xlu1 %v2543_v23, %s2084_s26  ;;  %1230 = vrot.lane.b32.xlu0 %v2541_v21, %s2084_s26 }
 0x4a4   : > { %1236 = vrot.lane.b32.xlu1 %v2551_v32, %s2084_s26  ;;  %1234 = vrot.lane.b32.xlu0 %v2549_v28, %s2084_s26  ;;  %s2820_s26 = smov 111  }
 0x4a8   : > { %1274 = vrot.lane.b32.xlu1 %v2543_v23, %s2085_s25  ;;  %1272 = vrot.lane.b32.xlu0 %v2541_v21, %s2085_s25 }
 0x4ac   : > { %1278 = vrot.lane.b32.xlu1 %v2551_v32, %s2085_s25  ;;  %1276 = vrot.lane.b32.xlu0 %v2549_v28, %s2085_s25  ;;  %s2091_s25 = smov [#allocation6]  }
 0x4b0   : > { %1320 = vrot.lane.b32.xlu1 %v2543_v23, %s2086_s20  ;;  %1318 = vrot.lane.b32.xlu0 %v2541_v21, %s2086_s20 }
 0x4b4   : > { %1324 = vrot.lane.b32.xlu1 %v2551_v32, %s2086_s20  ;;  %1322 = vrot.lane.b32.xlu0 %v2549_v28, %s2086_s20  ;;  %s2014_s20 = sshll.u32 %s2091_s25, 4  ;;  %s2015_s20 = int_to_ptr.vmem [resolvable:$false] %s2014_s20 }
 0x4b8   : > { %1362 = vrot.lane.b32.xlu1 %v2543_v23, %s2087_s23  ;;  %1360 = vrot.lane.b32.xlu0 %v2541_v21, %s2087_s23 }
 0x4bc   : > { %1366 = vrot.lane.b32.xlu1 %v2551_v32, %s2087_s23  ;;  %1364 = vrot.lane.b32.xlu0 %v2549_v28, %s2087_s23  ;;  %s1796_s23 = sshll.u32 %s2247_s29, 5 }
 0x4bd   : > { %s368_s28 = scalar_lea.vmem [#allocation6], %s1796_s23  ;;  %s2016_s23 = scalar_lea.vmem %s2015_s20, 1024 }
 0x4be   : > { %s1703_s14 = sshll.u32 %s368_s28, 4  ;;  %s2749_s14 = int_to_ptr.vmem [resolvable:$true] %s1703_s14 }
 0x4bf   : > { %p2017_p10 = scmp.lt.s32.totalorder %s2749_s14, %s2015_s20 }
 0x4c0   : > { %1404 = vrot.lane.b32.xlu1 %v2543_v23, %s2819_s17  ;;  %1402 = vrot.lane.b32.xlu0 %v2541_v21, %s2819_s17 }
 0x4c4   : > { %1408 = vrot.lane.b32.xlu1 %v2551_v32, %s2819_s17  ;;  %1406 = vrot.lane.b32.xlu0 %v2549_v28, %s2819_s17 }
 0x4c8   : > { %1446 = vrot.lane.b32.xlu1 %v2543_v23, %s2820_s26  ;;  %1444 = vrot.lane.b32.xlu0 %v2541_v21, %s2820_s26 }
 0x4cc   : > { %1450 = vrot.lane.b32.xlu1 %v2551_v32, %s2820_s26  ;;  %1448 = vrot.lane.b32.xlu0 %v2549_v28, %s2820_s26  ;;  %s2010_s26 = scalar_lea.vmem %s2749_s14, 512 }
 0x4cd   : > { %p2011_p6 = scmp.ne.s32.totalorder %s2749_s14, %s2010_s26  ;;  %p2018_p0 = scmp.lt.s32.totalorder %s2016_s23, %s2010_s26 }
 0x4cf   : > { %p2012_p13 = pnand %p2011_p6, %p2821_p12  ;;  %p2019_p2 = por %p2018_p0, %p2017_p10 }
 0x4d0   : > { %1530 = vperm.xlu0 %1966, %v1527_v33   ;;  %v1289_v33 = vrot.slane %v1816_v16, %v2370_v26 }
 0x4d1   : > { %p2013_p8 = pneg %p2012_p13 }
 0x4d3   : > { %p2020_p4 = pnand %p2019_p2, %p2013_p8 }
 0x502   : > { %v1149_v4 = vpop.permute.xlu1 %1148  ;;  %v1147_v34 = vpop.permute.xlu0 %1146 }
 0x503   : > { %v1156_v43 = vsel %vm532_vm5, %v1147_v34, %v1149_v4 }
 0x504   : > { %v1181_v51 = vmul.f32 %v1167_v39, %v1156_v43 }
 0x506   : > { %v1153_v37 = vpop.permute.xlu1 %1152  ;;  %v1151_v38 = vpop.permute.xlu0 %1150 }
 0x507   : > { %v1157_v48 = vsel %vm532_vm5, %v1153_v37, %v1147_v34  ;;  %v1155_v31 = vsel %vm532_vm5, %v1149_v4, %v1151_v38  ;;  %v1154_v54 = vsel %vm532_vm5, %v1151_v38, %v1153_v37  ;;  %v1297_v4 = vrot.slane %v1816_v16, %v2379_v29 }
 0x508   : > { %v1180_v55 = vmul.f32 %v1163_v44, %v1157_v48  ;;  %v1182_v58 = vmul.f32 %v1171_v45, %v1155_v31  ;;  %v1183_v0 = vmul.f32 %v1175_v46, %v1154_v54  ;;  %v1301_v37 = vrot.slane %v1816_v16, %v2381_v30 }
 0x50a   : > { %v1191_v5 = vpop.permute.xlu1 %1190  ;;  %v1189_v47 = vpop.permute.xlu0 %1188 }
 0x50b   : > { %v1198_v40 = vsel %vm575_vm6, %v1189_v47, %v1191_v5 }
 0x50c   : > { %v1223_v42 = vmul.f32 %v1209_v41, %v1198_v40 }
 0x50e   : > { %v1195_v56 = vpop.permute.xlu1 %1194  ;;  %v1193_v57 = vpop.permute.xlu0 %1192  ;;  %v1867_v53 = vpack.c.bf16 %v1223_v42, %v1181_v51  ;;  %v1817_v51 = vld [vmem:[%s2799_s0 + $0x14] sm:$0xf] }
 0x50f   : > { %v1199_v59 = vsel %vm575_vm6, %v1195_v56, %v1189_v47  ;;  %v1196_v62 = vsel %vm575_vm6, %v1193_v57, %v1195_v56  ;;  %v1197_v63 = vsel %vm575_vm6, %v1191_v5, %v1193_v57  ;;  %v1335_v56 = vrot.slane %v1817_v51, %v2370_v26 }
 0x510   : > { %v1222_v1 = vmul.f32 %v1205_v49, %v1199_v59  ;;  %v1224_v2 = vmul.f32 %v1213_v50, %v1197_v63  ;;  %v1225_v3 = vmul.f32 %v1217_v52, %v1196_v62  ;;  %1868 = vmatprep.subr.bf16.mxu0 %v1867_v53  ;;  %v1347_v57 = vrot.slane %v1817_v51, %v2381_v30 }
 0x511   : > { %v1343_v59 = vrot.slane %v1817_v51, %v2379_v29 }
 0x512   : > { %v1869_v6 = vpack.c.bf16 %v1222_v1, %v1180_v55  ;;  %v1889_v7 = vpack.c.bf16 %v1224_v2, %v1182_v58  ;;  %v1233_v8 = vpop.permute.xlu1 %1232  ;;  %v1231_v10 = vpop.permute.xlu0 %1230  ;;  %v1887_v11 = vpack.c.bf16 %v1225_v3, %v1183_v0  ;;  %v1339_v58 = vrot.slane %v1817_v51, %v2368_v25 }
 0x513   : > { %v1240_v61 = vsel %vm619_vm7, %v1231_v10, %v1233_v8 }
 0x514   : > { %1870 = vmatpush1.bf16.msra.mxu0 %v1869_v6  ;;  %1888 = vmatprep.subr.bf16.mxu1 %v1887_v11  ;;  %v1265_v34 = vmul.f32 %v1251_v17, %v1240_v61  ;;  %v1819_v61 = vld [vmem:[%s2799_s0 + $0x1c] sm:$0xf] }
 0x515   : > { %1890 = vmatpush1.bf16.msra.mxu1 %v1889_v7 }
 0x516   : > { %v1237_v14 = vpop.permute.xlu1 %1236  ;;  %v1235_v9 = vpop.permute.xlu0 %1234 }
 0x517   : > { %v1241_v24 = vsel %vm619_vm7, %v1237_v14, %v1231_v10  ;;  %v1239_v35 = vsel %vm619_vm7, %v1233_v8, %v1235_v9  ;;  %v1238_v38 = vsel %vm619_vm7, %v1235_v9, %v1237_v14 }
 0x518   : > { %v1264_v39 = vmul.f32 %v1247_v60, %v1241_v24  ;;  %v1266_v45 = vmul.f32 %v1255_v13, %v1239_v35  ;;  %v1267_v48 = vmul.f32 %v1259_v19, %v1238_v38 }
 0x51a   : > { %v1275_v15 = vpop.permute.xlu1 %1274  ;;  %v1273_v20 = vpop.permute.xlu0 %1272 }
 0x51b   : > { %v1282_v27 = vsel %vm663_vm8, %v1273_v20, %v1275_v15 }
 0x51c   : > { %v1307_v36 = vmul.f32 %v1293_v18, %v1282_v27  ;;  %v1431_v27 = vrot.slane %v1819_v61, %v2381_v30 }
 0x51e   : > { %v1279_v41 = vpop.permute.xlu1 %1278  ;;  %v1277_v43 = vpop.permute.xlu0 %1276  ;;  %v1871_v44 = vpack.c.bf16 %v1307_v36, %v1265_v34 }
 0x51f   : > { %v1283_v46 = vsel %vm663_vm8, %v1279_v41, %v1273_v20  ;;  %v1280_v5 = vsel %vm663_vm8, %v1277_v43, %v1279_v41  ;;  %v1281_v47 = vsel %vm663_vm8, %v1275_v15, %v1277_v43  ;;  %v1419_v20 = vrot.slane %v1819_v61, %v2370_v26 }
 0x520   : > { %v1306_v40 = vmul.f32 %v1289_v33, %v1283_v46  ;;  %v1308_v49 = vmul.f32 %v1297_v4, %v1281_v47  ;;  %v1309_v50 = vmul.f32 %v1301_v37, %v1280_v5  ;;  %1872 = vmatprep.subr.bf16.mxu0 %v1871_v44  ;;  %v1423_v33 = vrot.slane %v1819_v61, %v2368_v25 }
 0x521   : > { %v1427_v4 = vrot.slane %v1819_v61, %v2379_v29 }
 0x522   : > { %v1873_v31 = vpack.c.bf16 %v1306_v40, %v1264_v39  ;;  %v1893_v42 = vpack.c.bf16 %v1308_v49, %v1266_v45  ;;  %v1321_v52 = vpop.permute.xlu1 %1320  ;;  %v1319_v54 = vpop.permute.xlu0 %1318  ;;  %v1891_v55 = vpack.c.bf16 %v1309_v50, %v1267_v48  ;;  %v1820_v49 = vld [vmem:[%s2799_s0 + $0x20] sm:$0xf] }
 0x523   : > { %v1328_v53 = vsel %vm711_vm9, %v1319_v54, %v1321_v52 }
 0x524   : > { %1874 = vmatpush1.bf16.msra.mxu0 %v1873_v31  ;;  %1892 = vmatprep.subr.bf16.mxu1 %v1891_v55  ;;  %v1352_v0 = vmul.f32 %v1335_v56, %v1328_v53  ;;  %v1461_v56 = vrot.slane %v1820_v49, %v2370_v26 }
 0x525   : > { %1894 = vmatpush1.bf16.msra.mxu1 %v1893_v42 }
 0x526   : > { %v1325_v62 = vpop.permute.xlu1 %1324  ;;  %v1323_v63 = vpop.permute.xlu0 %1322  ;;  %v1877_v9 = vpack.c.bf16 %v1352_v0, %v2541_v21 }
 0x527   : > { %v1329_v1 = vsel %vm711_vm9, %v1325_v62, %v1319_v54  ;;  %v1326_v2 = vsel %vm711_vm9, %v1323_v63, %v1325_v62  ;;  %v1327_v3 = vsel %vm711_vm9, %v1321_v52, %v1323_v63 }
 0x528   : > { %v1355_v6 = vmul.f32 %v1347_v57, %v1329_v1  ;;  %v1353_v7 = vmul.f32 %v1339_v58, %v1327_v3  ;;  %v1354_v8 = vmul.f32 %v1343_v59, %v1326_v2  ;;  %v1473_v57 = vrot.slane %v1820_v49, %v2381_v30 }
 0x529   : > { %v1465_v58 = vrot.slane %v1820_v49, %v2368_v25  ;;  %v1469_v59 = vrot.slane %v1820_v49, %v2379_v29 }
 0x52a   : > { %v1897_v10 = vpack.c.bf16 %v1354_v8, %v2549_v28  ;;  %v1363_v11 = vpop.permute.xlu1 %1362  ;;  %v1361_v12 = vpop.permute.xlu0 %1360  ;;  %v1875_v16 = vpack.c.bf16 %v1353_v7, %v2543_v23  ;;  %v1895_v14 = vpack.c.bf16 %v1355_v6, %v2551_v32  ;;  %v1818_v28 = vld [vmem:[%s2799_s0 + $0x18] sm:$0xf]  ;;  %v1977_v7 = vld [vmem:[%s2259_s27 + $0x8] sm:$0xff] }
 0x52b   : > { %v1389_v23 = vrot.slane %v1818_v28, %v2381_v30  ;;  %v1381_v32 = vrot.slane %v1818_v28, %v2368_v25  ;;  %v1385_v19 = vrot.slane %v1818_v28, %v2379_v29  ;;  %v1377_v34 = vrot.slane %v1818_v28, %v2370_v26  ;;  %v1976_v29 = vld [vmem:[%s2259_s27 + $0x10] sm:$0xff] }
 0x52c   : > { %1876 = vmatprep.subr.bf16.mxu0 %v1875_v16  ;;  %1896 = vmatprep.subr.bf16.mxu1 %v1895_v14  ;;  %v1370_v36 = vsel %vm755_vm10, %v1361_v12, %v1363_v11 }
 0x52d   : > { %1878 = vmatpush1.bf16.msra.mxu0 %v1877_v9  ;;  %1898 = vmatpush1.bf16.msra.mxu1 %v1897_v10  ;;  %v1394_v50 = vmul.f32 %v1377_v34, %v1370_v36  ;;  %v1978_v10 = vld [vmem:[%s2259_s27 + $0x18] sm:$0xff] }
 0x52e   : > { %v1367_v17 = vpop.permute.xlu1 %1366  ;;  %v1365_v18 = vpop.permute.xlu0 %1364 }
 0x52f   : > { %v1371_v13 = vsel %vm755_vm10, %v1367_v17, %v1361_v12  ;;  %v1369_v15 = vsel %vm755_vm10, %v1363_v11, %v1365_v18  ;;  %v1368_v35 = vsel %vm755_vm10, %v1365_v18, %v1367_v17  ;;  %v1979_v12 = vld [vmem:[%s2259_s27] sm:$0xff]  ;;  %s1834_s27 = sshll.u32 %s2164_s13, 9  ;;  %s1689_s13 = scalar_lea.sflag [#allocation5], %s2247_s29 }
 0x530   : > { %v1397_v37 = vmul.f32 %v1389_v23, %v1371_v13  ;;  %v1395_v38 = vmul.f32 %v1381_v32, %v1369_v15  ;;  %v1396_v5 = vmul.f32 %v1385_v19, %v1368_v35  ;;  %s2754_s17 = scalar_lea.hbm %s2808_s9, %s1834_s27 }
 0x532   : > { %v1405_v60 = vpop.permute.xlu1 %1404  ;;  %v1403_v21 = vpop.permute.xlu0 %1402 }
 0x533   : > { %v1412_v24 = vsel %vm799_vm11, %v1403_v21, %v1405_v60 }
 0x534   : > { %v1436_v43 = vmul.f32 %v1419_v20, %v1412_v24 }
 0x536   : > { %v1409_v39 = vpop.permute.xlu1 %1408  ;;  %v1407_v41 = vpop.permute.xlu0 %1406  ;;  %v1881_v55 = vpack.c.bf16 %v1436_v43, %v1394_v50 }
 0x537   : > { %v1413_v44 = vsel %vm799_vm11, %v1409_v39, %v1403_v21  ;;  %v1410_v45 = vsel %vm799_vm11, %v1407_v41, %v1409_v39  ;;  %v1411_v46 = vsel %vm799_vm11, %v1405_v60, %v1407_v41 }
 0x538   : > { %v1439_v47 = vmul.f32 %v1431_v27, %v1413_v44  ;;  %v1437_v48 = vmul.f32 %v1423_v33, %v1411_v46  ;;  %v1438_v40 = vmul.f32 %v1427_v4, %v1410_v45 }
 0x53a   : > { %v1901_v51 = vpack.c.bf16 %v1438_v40, %v1396_v5  ;;  %v1447_v31 = vpop.permute.xlu1 %1446  ;;  %v1445_v42 = vpop.permute.xlu0 %1444  ;;  %v1879_v52 = vpack.c.bf16 %v1437_v48, %v1395_v38  ;;  %v1899_v54 = vpack.c.bf16 %v1439_v47, %v1397_v37 }
 0x53b   : > { %v1454_v53 = vsel %vm843_vm12, %v1445_v42, %v1447_v31 }
 0x53c   : > { %1880 = vmatprep.subr.bf16.mxu0 %v1879_v52  ;;  %1900 = vmatprep.subr.bf16.mxu1 %v1899_v54  ;;  %v1478_v26 = vmul.f32 %v1461_v56, %v1454_v53 }
 0x53d   : > { %1882 = vmatpush1.bf16.msra.mxu0 %v1881_v55  ;;  %1902 = vmatpush1.bf16.msra.mxu1 %v1901_v51 }
 0x53e   : > { %v1451_v62 = vpop.permute.xlu1 %1450  ;;  %v1449_v63 = vpop.permute.xlu0 %1448  ;;  %v1885_v16 = vpack.c.bf16 %v1979_v12, %v1478_v26 }
 0x53f   : > { %v1455_v30 = vsel %vm843_vm12, %v1451_v62, %v1445_v42  ;;  %v1452_v0 = vsel %vm843_vm12, %v1449_v63, %v1451_v62  ;;  %v1453_v1 = vsel %vm843_vm12, %v1447_v31, %v1449_v63 }
 0x540   : > { %v1481_v2 = vmul.f32 %v1473_v57, %v1455_v30  ;;  %v1479_v25 = vmul.f32 %v1465_v58, %v1453_v1  ;;  %v1480_v3 = vmul.f32 %v1469_v59, %v1452_v0 }
 0x542   : > { %v1905_v6 = vpack.c.bf16 %v1976_v29, %v1480_v3  ;;  %v1883_v8 = vpack.c.bf16 %v1977_v7, %v1479_v25  ;;  %v1903_v11 = vpack.c.bf16 %v1978_v10, %v1481_v2 }
 0x544   : > { %1884 = vmatprep.subr.bf16.mxu0 %v1883_v8  ;;  %1904 = vmatprep.subr.bf16.mxu1 %v1903_v11 }
 0x545   : > { %1886 = vmatpush1.bf16.msra.mxu0 %v1885_v16  ;;  %1906 = vmatpush1.bf16.msra.mxu1 %v1905_v6 }
 0x548   : > { %1821 = vmatmul.mubr.msk.f32.vlgmr.msra.gmra.mrb[2].mxu0 %vm1533_vm2, %v1486_v22  ;;  %1822 = vmatmul.mubr.msk.f32.vlgmr.msra.gmra.mrb[2].mxu1 %vm1533_vm2, %v1486_v22 }
 0x54f   : > { %v1531_v14 = vpop.permute.xlu0 %1530 }
 0x61b   : > { %v1603_v9 = vpop.f32.mrb[2].mxu0  ;;  %v1674_v17 = vpop.f32.mrb[2].mxu1 }
 0x61c   : > { %v1604_v18 = vadd.f32 %v1603_v9, %v1531_v14  ;;  %v1675_v61 = vadd.f32 %v1674_v17, %v1531_v14  ;;  %v1605_v28 = vpop.f32.mrb[3].mxu0  ;;  %v1676_v23 = vpop.f32.mrb[3].mxu1 }
 0x61d   : > { %v1606_v32 = vadd.f32 %v1605_v28, %v1531_v14  ;;  %v1677_v60 = vadd.f32 %v1676_v23, %v1531_v14 }
 0x61e   : > { %v1679_v21 = vmul.f32 0.70710677, %v1604_v18  ;;  %v1681_v13 = vmul.f32 0.70710677, %v1675_v61 }
 0x61f   : > { %v1680_v19 = vmul.f32 0.70710677, %v1606_v32  ;;  %v1682_v15 = vmul.f32 0.70710677, %v1677_v60 }
 0x620   : > { %1683 = vst [vmem:[%s368_s28] sm:$0xff] %v1679_v21  ;;  %1823 = vst [vmem:[%s368_s28 + $0x10] sm:$0xff] %v1681_v13 }
 0x621   : > { %1684 = vst [vmem:[%s368_s28 + $0x8] sm:$0xff] %v1680_v19  ;;  %1824 = vst [vmem:[%s368_s28 + $0x18] sm:$0xff] %v1682_v15 }
 0x622   : > { %2023 = shalt.err (!%p2020_p4)
}
 0x623   : > { %s2024_s28 = scalar_lea.hbm %s2754_s17, 512  ;;  %s2028_s19 = scalar_lea.hbm %s2808_s9, 1024 }
 0x624   : > { %p2025_p5 = scmp.ne.s32.totalorder %s2754_s17, %s2024_s28  ;;  %p2029_p1 = scmp.lt.u32.totalorder %s2754_s17, %s2808_s9 }
 0x625   : > { %p2030_p3 = scmp.lt.u32.totalorder %s2028_s19, %s2024_s28  ;;  %p2032_p6 = scmp.lt.u32.totalorder %s2024_s28, %s2754_s17 }
 0x626   : > { %p2026_p7 = pnand %p2025_p5, %p2821_p12 }
 0x627   : > { %p2031_p11 = por %p2030_p3, %p2029_p1 }
 0x628   : > { %p2027_p9 = pneg %p2026_p7 }
 0x629   : > { %p2033_p13 = por %p2032_p6, %p2031_p11 }
 0x62b   : > { %p2034_p8 = pnand %p2033_p13, %p2027_p9 }
 0x62d   : > { %2037 = shalt.err (!%p2034_p8)
}
 0x62e   : > { %s2092_s26 = smov 256  }
 0x62f   : > { %1909 = dma.vmem_to_hbm [thread:$0]  (%p2821_p12), %s2749_s14, 512, %s2754_s17, %s1689_s13, %s2092_s26, %s2092_s26, %s2082_s16  }
 0x630 PF: > { %s1718_s23 = sand.u32 1, %s2064_s30   ;;  %p2822_p10 = scmp.ne.s32.totalorder %s2817_s22, 0 }
 0x631   : > { %p2823_p0 = scmp.ge.s32.totalorder %s2076_s12, 2  ;;  %s1719_s28 = scalar_lea.sflag [#allocation5], %s1718_s23 }
 0x633   : > { %p1916_p2 = pnand %p2823_p0, %p2822_p10 }
 0x635   : > { %2059 = dma.done.wait (!%p1916_p2), %s1719_s28, 512  }
 0x636   : > { %2061 = vsyncadd (!%p1916_p2), %s1719_s28, 4294966784  ;;  %p22_p4 = scmp.ge.s32.totalorder %s2168_s15, 4   ;;  %s2824_s30 = smov %s2068_s10 }
 0x637   : > { %s2825_s10 = smov %s2072_s11  ;;  %s2826_s11 = smov %s2180_s18 }
 0x638   : > { %s2827_s12 = smov %s2168_s15  ;;  %24 = sbr.rel (!%p22_p4) target bundleno = 5 (0x5), region = 114 }
 0x63f   :  { %1724 = vsyncpa [#allocation4], 1 }
 0x640   :  { %1726 = vsyncpa [#allocation4 + $0x1], 1 }
 0x641   :  { %1727 = vsyncpa [#allocation5], 1 }
 0x642   :  { %1729 = vsyncpa [#allocation5 + $0x1], 1 }

</bundles_post_ra>
